<compile_context>
chip_gen: v5e
topology: v5e:2x2
jax: 0.10.0
libtpu: 0.0.40
codegen_flags: <defaults>
</compile_context>

<pallas_src>
import numpy as np
import jax
import jax.numpy as jnp
from jax.experimental import pallas as pl
from jax.experimental.pallas import tpu as pltpu


def _round_up(x, m):
    return ((x + m - 1) // m) * m


def _lstm_yz_kernel(x_ref, wih_hbm, whh_hbm, wout_hbm, bg_ref, bo_ref,
                    lab_ref, msk_ref,
                    nll_ref,                                   # output: (1, 1, bs_p)
                    wih_s, whh_s, wout_s, xg_s, hs_s, h_s, c_s, dma_sems):
    c_idx = pl.program_id(0)
    BS, Hp = h_s.shape                       # padded batch, padded hidden
    TB = hs_s.shape[0]                       # t_chunk * BS
    T = TB // BS                             # timesteps per chunk

    # ---- chunk 0: pull the (constant) weights into VMEM once; init state ----
    @pl.when(c_idx == 0)
    def _():
        cp0 = pltpu.make_async_copy(wih_hbm, wih_s, dma_sems.at[0])
        cp1 = pltpu.make_async_copy(whh_hbm, whh_s, dma_sems.at[1])
        cp2 = pltpu.make_async_copy(wout_hbm, wout_s, dma_sems.at[2])
        cp0.start(); cp1.start(); cp2.start()
        cp0.wait(); cp1.wait(); cp2.wait()
        h_s[...] = jnp.zeros_like(h_s)
        c_s[...] = jnp.zeros_like(c_s)

    # ---- hoisted input projection: one GEMM for the whole chunk, bias folded ----
    xg_s[...] = (jnp.dot(x_ref[0], wih_s[...],
                         preferred_element_type=jnp.float32) + bg_ref[...])

    # ---- LSTM recurrence (statically unrolled); only h @ W_hh^T per step ----
    w_hh = whh_s[...]                        # (Hp, 4Hp) bf16
    h_bf = h_s[...]                          # (BS, Hp)  bf16 carried state
    c = c_s[...]                             # (BS, Hp)  f32  carried state
    for tc in range(T):
        gates = xg_s[tc * BS:(tc + 1) * BS, :] + jnp.dot(
            h_bf, w_hh, preferred_element_type=jnp.float32)          # (BS, 4Hp) f32
        i_g = jax.nn.sigmoid(gates[:, 0 * Hp:1 * Hp])
        f_g = jax.nn.sigmoid(gates[:, 1 * Hp:2 * Hp])
        g_g = jnp.tanh(gates[:, 2 * Hp:3 * Hp])
        o_g = jax.nn.sigmoid(gates[:, 3 * Hp:4 * Hp])
        c = f_g * c + i_g * g_g
        h_bf = (o_g * jnp.tanh(c)).astype(jnp.bfloat16)
        hs_s[tc * BS:(tc + 1) * BS, :] = h_bf
    h_s[...] = h_bf
    c_s[...] = c

    # ---- batched vocab projection + masked cross-entropy for the chunk ----
    logits = jnp.dot(hs_s[...], wout_s[...],
                     preferred_element_type=jnp.float32) + bo_ref[...]   # (TB, Vp)
    mx = jnp.max(logits, axis=-1, keepdims=True)
    lse = mx + jnp.log(jnp.sum(jnp.exp(logits - mx), axis=-1, keepdims=True))
    lab = lab_ref[0]                                   # (TB, 1) int32
    col = jax.lax.broadcasted_iota(jnp.int32, logits.shape, 1)
    gold = jnp.sum(jnp.where(col == lab, logits, 0.0), axis=-1, keepdims=True)
    masked = (lse - gold) * msk_ref[0]                 # (TB, 1) f32, padded rows -> 0

    # reduce over the chunk's timesteps per batch row (rows ordered tc*BS + b):
    acc = jnp.zeros((BS, 1), jnp.float32)
    for tc in range(T):
        acc = acc + masked[tc * BS:(tc + 1) * BS, :]   # (BS, 1)

    # flip the small (BS,1) column into a lane-oriented (1,BS) row without an
    # awkward tiny transpose: diagonal select + sublane reduce.
    ri = jax.lax.broadcasted_iota(jnp.int32, (BS, BS), 0)
    ci = jax.lax.broadcasted_iota(jnp.int32, (BS, BS), 1)
    nll_row = jnp.sum(jnp.where(ri == ci, acc, 0.0), axis=0, keepdims=True)  # (1, BS)
    nll_ref[0] = nll_row


def lstm_yz_forward(params, yvecs, zvecs, tgts, tgts_mask, t_chunk=8):
    """Returns (teacher-forcing loss, pvecs) like lstm_yz.forward (eval mode)."""
    embed_w = params["embed"]                                   # (V, E)
    bs, sl = tgts.shape
    H = params["w_hh"].shape[1]
    V = params["w_out"].shape[0]
    E = embed_w.shape[1]
    Z = zvecs.shape[-1]
    Y = yvecs.shape[-1]
    D = E + Z + Y

    # --- glue: embedding gather, broadcast, concat (plain JAX) ---
    tgts_embed = jnp.take(embed_w, tgts, axis=0)                # (bs, sl, E)
    z_exp = jnp.broadcast_to(zvecs[:, None, :], (bs, sl, Z))
    y_exp = jnp.broadcast_to(yvecs[:, None, :], (bs, sl, Y))
    input_vecs = jnp.concatenate([tgts_embed, z_exp, y_exp], axis=-1)   # (bs, sl, D)
    pvecs = jnp.concatenate([tgts_embed, z_exp], axis=-1)

    # --- vreg-aligned padded sizes ---
    bs_p = _round_up(bs, 8)
    Hp = _round_up(H, 128)
    Vp = _round_up(V, 128)
    nc = -(-sl // t_chunk)                   # number of time chunks
    sl_p = nc * t_chunk
    TB = t_chunk * bs_p

    # --- time-major input, padded, laid out as per-chunk (TB, D) slabs ---
    x = jnp.transpose(input_vecs, (1, 0, 2))                    # (sl, bs, D)
    x = jnp.pad(x, ((0, sl_p - sl), (0, bs_p - bs), (0, 0)))
    x_blk = x.reshape(nc, TB, D).astype(jnp.bfloat16)           # row = tc*bs_p + b

    # --- teacher-forced labels (t+1) + their mask, time-major, padded ---
    labels_next = jnp.concatenate(
        [tgts[:, 1:], jnp.zeros((bs, 1), tgts.dtype)], axis=1)          # (bs, sl)
    mask_next = jnp.concatenate(
        [tgts_mask[:, 1:], jnp.zeros((bs, 1), tgts_mask.dtype)], axis=1)
    lab_tm = jnp.pad(jnp.transpose(labels_next, (1, 0)).astype(jnp.int32),
                     ((0, sl_p - sl), (0, bs_p - bs)))                  # (sl_p, bs_p)
    msk_tm = jnp.pad(jnp.transpose(mask_next, (1, 0)).astype(jnp.float32),
                     ((0, sl_p - sl), (0, bs_p - bs)))
    labels_blk = lab_tm.reshape(nc, TB, 1)
    mask_blk = msk_tm.reshape(nc, TB, 1)

    # --- weights: per-gate zero-pad H->Hp, pre-transpose, bf16 MXU operands ---
    def pad_gates(w):                        # (4H, X) -> (4*Hp, X), gate-blockwise
        X = w.shape[1]
        w4 = w.reshape(4, H, X)
        w4 = jnp.pad(w4, ((0, 0), (0, Hp - H), (0, 0)))
        return w4.reshape(4 * Hp, X)

    w_ih_t = jnp.transpose(pad_gates(params["w_ih"])).astype(jnp.bfloat16)  # (D, 4Hp)
    w_hh_p = jnp.pad(pad_gates(params["w_hh"]), ((0, 0), (0, Hp - H)))
    w_hh_t = jnp.transpose(w_hh_p).astype(jnp.bfloat16)                     # (Hp, 4Hp)
    b_gate = (params["b_ih"] + params["b_hh"]).reshape(4, H)
    b_gate = jnp.pad(b_gate, ((0, 0), (0, Hp - H))).reshape(1, 4 * Hp)
    b_gate = b_gate.astype(jnp.float32)

    w_out_p = jnp.pad(params["w_out"], ((0, Vp - V), (0, Hp - H)))
    w_out_t = jnp.transpose(w_out_p).astype(jnp.bfloat16)                   # (Hp, Vp)
    b_out = jnp.pad(params["b_out"].astype(jnp.float32), (0, Vp - V),
                    constant_values=-1e30).reshape(1, Vp)   # padded vocab -> -inf-ish

    nll_out = pl.pallas_call(
        _lstm_yz_kernel,
        out_shape=jax.ShapeDtypeStruct((nc, 1, bs_p), jnp.float32),
        grid_spec=pltpu.PrefetchScalarGridSpec(
            num_scalar_prefetch=0,
            grid=(nc,),
            in_specs=[
                pl.BlockSpec((1, TB, D), lambda c: (c, 0, 0)),      # x chunk (bf16)
                pl.BlockSpec(memory_space=pl.ANY),                  # W_ih^T (HBM, copied once)
                pl.BlockSpec(memory_space=pl.ANY),                  # W_hh^T
                pl.BlockSpec(memory_space=pl.ANY),                  # W_out^T
                pl.BlockSpec((1, 4 * Hp), lambda c: (0, 0)),        # fused gate bias
                pl.BlockSpec((1, Vp), lambda c: (0, 0)),            # output bias
                pl.BlockSpec((1, TB, 1), lambda c: (c, 0, 0)),      # labels (t+1)
                pl.BlockSpec((1, TB, 1), lambda c: (c, 0, 0)),      # mask   (t+1)
            ],
            out_specs=pl.BlockSpec((1, 1, bs_p), lambda c: (c, 0, 0)),
            scratch_shapes=[
                pltpu.VMEM((D, 4 * Hp), jnp.bfloat16),      # W_ih^T resident (1 copy)
                pltpu.VMEM((Hp, 4 * Hp), jnp.bfloat16),     # W_hh^T resident
                pltpu.VMEM((Hp, Vp), jnp.bfloat16),         # W_out^T resident
                pltpu.VMEM((TB, 4 * Hp), jnp.float32),      # chunk input projection
                pltpu.VMEM((TB, Hp), jnp.bfloat16),         # chunk hidden states
                pltpu.VMEM((bs_p, Hp), jnp.bfloat16),       # carried h
                pltpu.VMEM((bs_p, Hp), jnp.float32),        # carried c
                pltpu.SemaphoreType.DMA((3,)),
            ]),
        compiler_params=pltpu.CompilerParams(
            dimension_semantics=("arbitrary",),
            vmem_limit_bytes=32 * 1024 * 1024),
    )(x_blk, w_ih_t, w_hh_t, w_out_t, b_gate, b_out, labels_blk, mask_blk)

    # --- tiny epilogue in plain JAX: sum chunks, normalize, mean over batch ---
    num = jnp.sum(nll_out[:, 0, :], axis=0)[:bs]                # (bs,) masked NLL sums
    den = jnp.sum(msk_tm, axis=0)[:bs]                          # == tgts_mask[:,1:].sum(-1)
    loss = jnp.mean(num / den)
    return loss, pvecs


def _ref_forward(params, yvecs, zvecs, tgts, tgts_mask):
    """Pure-JAX f32 reference mirroring the PyTorch module."""
    embed_w = params["embed"]
    bs, sl = tgts.shape
    te = jnp.take(embed_w, tgts, axis=0)
    z_exp = jnp.broadcast_to(zvecs[:, None, :], (bs, sl, zvecs.shape[-1]))
    y_exp = jnp.broadcast_to(yvecs[:, None, :], (bs, sl, yvecs.shape[-1]))
    xv = jnp.concatenate([te, z_exp, y_exp], -1)
    H = params["w_hh"].shape[1]

    def step(carry, x_t):
        h, c = carry
        g = (x_t @ params["w_ih"].T + params["b_ih"]
             + h @ params["w_hh"].T + params["b_hh"])
        i, f, gg, o = jnp.split(g, 4, axis=-1)
        i, f, o = jax.nn.sigmoid(i), jax.nn.sigmoid(f), jax.nn.sigmoid(o)
        c = f * c + i * jnp.tanh(gg)
        h = o * jnp.tanh(c)
        return (h, c), h

    h0 = jnp.zeros((bs, H), jnp.float32)
    c0 = jnp.zeros((bs, H), jnp.float32)
    _, hs = jax.lax.scan(step, (h0, c0), jnp.transpose(xv, (1, 0, 2)))
    hs = jnp.transpose(hs, (1, 0, 2))                       # (bs, sl, H)
    logits = hs @ params["w_out"].T + params["b_out"]
    pred = logits[:, :-1, :]
    labels = tgts[:, 1:]
    lse = jax.nn.logsumexp(pred, axis=-1)
    gold = jnp.take_along_axis(pred, labels[..., None], axis=-1)[..., 0]
    nll = lse - gold
    m = tgts_mask[:, 1:]
    return jnp.mean(jnp.sum(nll * m, -1) / jnp.sum(m, -1))


if __name__ == "__main__":
    # Small shapes consistent with the module.
    vocab_size, embed_dim = 64, 16
    ysize, zsize = 8, 8
    hidden_size = 32
    bs, sl = 2, 10
    D = embed_dim + zsize + ysize

    key = jax.random.PRNGKey(0)
    keys = jax.random.split(key, 10)
    s = 0.1
    params = {
        "embed": s * jax.random.normal(keys[0], (vocab_size, embed_dim), jnp.float32),
        "w_ih":  s * jax.random.normal(keys[1], (4 * hidden_size, D), jnp.float32),
        "w_hh":  s * jax.random.normal(keys[2], (4 * hidden_size, hidden_size), jnp.float32),
        "b_ih":  s * jax.random.normal(keys[3], (4 * hidden_size,), jnp.float32),
        "b_hh":  s * jax.random.normal(keys[4], (4 * hidden_size,), jnp.float32),
        "w_out": s * jax.random.normal(keys[5], (vocab_size, hidden_size), jnp.float32),
        "b_out": s * jax.random.normal(keys[6], (vocab_size,), jnp.float32),
    }

    yvecs = jax.random.normal(keys[7], (bs, ysize), jnp.float32)
    zvecs = jax.random.normal(keys[8], (bs, zsize), jnp.float32)
    tgts = jax.random.randint(keys[9], (bs, sl), 1, vocab_size, jnp.int32)
    lengths = jnp.array([sl, sl - 2], jnp.int32)
    tgts_mask = (jnp.arange(sl)[None, :] < lengths[:, None]).astype(jnp.float32)

    # t_chunk=4 -> 3 time-chunks (exercises chunk carry + tail padding).
    loss, pvecs = lstm_yz_forward(params, yvecs, zvecs, tgts, tgts_mask, t_chunk=4)
    loss = jax.block_until_ready(loss)
    pvecs = jax.block_until_ready(pvecs)

    loss_ref = jax.block_until_ready(_ref_forward(params, yvecs, zvecs, tgts, tgts_mask))
    assert pvecs.shape == (bs, sl, embed_dim + zsize)
    # bf16 matmul operands in the kernel vs f32 reference -> modest tolerance.
    np.testing.assert_allclose(np.asarray(loss), np.asarray(loss_ref), rtol=1e-2, atol=1e-2)

    print("KERNEL_OK")
</pallas_src>

<mosaic_0001>
module attributes {stable_mosaic.version = 11 : i64} {
  func.func @_lstm_yz_kernel(%arg0: i32, %arg1: memref<1x32x32xbf16, #tpu.memory_space<vmem>>, %arg2: memref<32x512xbf16, #tpu.memory_space<any>>, %arg3: memref<128x512xbf16, #tpu.memory_space<any>>, %arg4: memref<128x128xbf16, #tpu.memory_space<any>>, %arg5: memref<1x512xf32, #tpu.memory_space<vmem>>, %arg6: memref<1x128xf32, #tpu.memory_space<vmem>>, %arg7: memref<1x32x1xi32, #tpu.memory_space<vmem>>, %arg8: memref<1x32x1xf32, #tpu.memory_space<vmem>>, %arg9: memref<1x1x8xf32, #tpu.memory_space<vmem>>, %arg10: memref<32x512xbf16, #tpu.memory_space<vmem>>, %arg11: memref<128x512xbf16, #tpu.memory_space<vmem>>, %arg12: memref<128x128xbf16, #tpu.memory_space<vmem>>, %arg13: memref<32x512xf32, #tpu.memory_space<vmem>>, %arg14: memref<32x128xbf16, #tpu.memory_space<vmem>>, %arg15: memref<8x128xbf16, #tpu.memory_space<vmem>>, %arg16: memref<8x128xf32, #tpu.memory_space<vmem>>, %arg17: memref<3x!tpu.dma_semaphore, #tpu.memory_space<semaphore_mem>>) attributes {dimension_semantics = [#tpu.dimension_semantics<arbitrary>], iteration_bounds = array<i64: 3>, scalar_prefetch = 0 : i64, scratch_operands = 8 : i64, tpu.core_type = #tpu.core_type<tc>, window_params = [{transform_indices = @transform_0, window_bounds = array<i64: 1, 32, 32>}, {}, {}, {}, {pipeline_mode = #tpu.pipeline_mode<synchronous>, transform_indices = @transform_4, window_bounds = array<i64: 1, 512>}, {pipeline_mode = #tpu.pipeline_mode<synchronous>, transform_indices = @transform_5, window_bounds = array<i64: 1, 128>}, {transform_indices = @transform_6, window_bounds = array<i64: 1, 32, 1>}, {transform_indices = @transform_7, window_bounds = array<i64: 1, 32, 1>}, {transform_indices = @transform_8, window_bounds = array<i64: 1, 1, 8>}]} {
    %c0_i32 = arith.constant 0 : i32
    %0 = arith.cmpi eq, %arg0, %c0_i32 : i32
    %1 = arith.extui %0 : i1 to i32
    %c0_i32_0 = arith.constant 0 : i32
    %2 = arith.cmpi ne, %1, %c0_i32_0 : i32
    scf.if %2 {
      %c0_i32_71 = arith.constant 0 : i32
      %185 = tpu.memref_slice %arg17[%c0_i32_71] : memref<3x!tpu.dma_semaphore, #tpu.memory_space<semaphore_mem>> -> memref<1x!tpu.dma_semaphore, #tpu.memory_space<semaphore_mem>>
      %186 = tpu.memref_squeeze %185 : memref<1x!tpu.dma_semaphore, #tpu.memory_space<semaphore_mem>> -> memref<!tpu.dma_semaphore, #tpu.memory_space<semaphore_mem>>
      tpu.enqueue_dma source(%arg2 : memref<32x512xbf16, #tpu.memory_space<any>>) target(%arg10 : memref<32x512xbf16, #tpu.memory_space<vmem>>) target_semaphore(%186 : memref<!tpu.dma_semaphore, #tpu.memory_space<semaphore_mem>>)
      %c1_i32 = arith.constant 1 : i32
      %187 = tpu.memref_slice %arg17[%c1_i32] : memref<3x!tpu.dma_semaphore, #tpu.memory_space<semaphore_mem>> -> memref<1x!tpu.dma_semaphore, #tpu.memory_space<semaphore_mem>>
      %188 = tpu.memref_squeeze %187 : memref<1x!tpu.dma_semaphore, #tpu.memory_space<semaphore_mem>> -> memref<!tpu.dma_semaphore, #tpu.memory_space<semaphore_mem>>
      tpu.enqueue_dma source(%arg3 : memref<128x512xbf16, #tpu.memory_space<any>>) target(%arg11 : memref<128x512xbf16, #tpu.memory_space<vmem>>) target_semaphore(%188 : memref<!tpu.dma_semaphore, #tpu.memory_space<semaphore_mem>>)
      %c2_i32 = arith.constant 2 : i32
      %189 = tpu.memref_slice %arg17[%c2_i32] : memref<3x!tpu.dma_semaphore, #tpu.memory_space<semaphore_mem>> -> memref<1x!tpu.dma_semaphore, #tpu.memory_space<semaphore_mem>>
      %190 = tpu.memref_squeeze %189 : memref<1x!tpu.dma_semaphore, #tpu.memory_space<semaphore_mem>> -> memref<!tpu.dma_semaphore, #tpu.memory_space<semaphore_mem>>
      tpu.enqueue_dma source(%arg4 : memref<128x128xbf16, #tpu.memory_space<any>>) target(%arg12 : memref<128x128xbf16, #tpu.memory_space<vmem>>) target_semaphore(%190 : memref<!tpu.dma_semaphore, #tpu.memory_space<semaphore_mem>>)
      %c0_i32_72 = arith.constant 0 : i32
      %191 = tpu.memref_slice %arg17[%c0_i32_72] : memref<3x!tpu.dma_semaphore, #tpu.memory_space<semaphore_mem>> -> memref<1x!tpu.dma_semaphore, #tpu.memory_space<semaphore_mem>>
      %192 = tpu.memref_squeeze %191 : memref<1x!tpu.dma_semaphore, #tpu.memory_space<semaphore_mem>> -> memref<!tpu.dma_semaphore, #tpu.memory_space<semaphore_mem>>
      tpu.wait_dma2 semaphore(%192 : memref<!tpu.dma_semaphore, #tpu.memory_space<semaphore_mem>>) src(%arg2 : memref<32x512xbf16, #tpu.memory_space<any>>) dst(%arg10 : memref<32x512xbf16, #tpu.memory_space<vmem>>)
      %c1_i32_73 = arith.constant 1 : i32
      %193 = tpu.memref_slice %arg17[%c1_i32_73] : memref<3x!tpu.dma_semaphore, #tpu.memory_space<semaphore_mem>> -> memref<1x!tpu.dma_semaphore, #tpu.memory_space<semaphore_mem>>
      %194 = tpu.memref_squeeze %193 : memref<1x!tpu.dma_semaphore, #tpu.memory_space<semaphore_mem>> -> memref<!tpu.dma_semaphore, #tpu.memory_space<semaphore_mem>>
      tpu.wait_dma2 semaphore(%194 : memref<!tpu.dma_semaphore, #tpu.memory_space<semaphore_mem>>) src(%arg3 : memref<128x512xbf16, #tpu.memory_space<any>>) dst(%arg11 : memref<128x512xbf16, #tpu.memory_space<vmem>>)
      %c2_i32_74 = arith.constant 2 : i32
      %195 = tpu.memref_slice %arg17[%c2_i32_74] : memref<3x!tpu.dma_semaphore, #tpu.memory_space<semaphore_mem>> -> memref<1x!tpu.dma_semaphore, #tpu.memory_space<semaphore_mem>>
      %196 = tpu.memref_squeeze %195 : memref<1x!tpu.dma_semaphore, #tpu.memory_space<semaphore_mem>> -> memref<!tpu.dma_semaphore, #tpu.memory_space<semaphore_mem>>
      tpu.wait_dma2 semaphore(%196 : memref<!tpu.dma_semaphore, #tpu.memory_space<semaphore_mem>>) src(%arg4 : memref<128x128xbf16, #tpu.memory_space<any>>) dst(%arg12 : memref<128x128xbf16, #tpu.memory_space<vmem>>)
      %cst_75 = arith.constant 0.000000e+00 : bf16
      %197 = vector.broadcast %cst_75 : bf16 to vector<8x128xbf16>
      %c0_76 = arith.constant 0 : index
      %c0_77 = arith.constant 0 : index
      %198 = vector.load %arg15[%c0_76, %c0_77] : memref<8x128xbf16, #tpu.memory_space<vmem>>, vector<8x128xbf16>
      tpu.vector_store %arg15[%c0_76, %c0_77], %197 {strides = array<i32>} : memref<8x128xbf16, #tpu.memory_space<vmem>>, vector<8x128xbf16>,
      %cst_78 = arith.constant 0.000000e+00 : f32
      %199 = vector.broadcast %cst_78 : f32 to vector<8x128xf32>
      %c0_79 = arith.constant 0 : index
      %c0_80 = arith.constant 0 : index
      %200 = vector.load %arg16[%c0_79, %c0_80] : memref<8x128xf32, #tpu.memory_space<vmem>>, vector<8x128xf32>
      tpu.vector_store %arg16[%c0_79, %c0_80], %199 {strides = array<i32>} : memref<8x128xf32, #tpu.memory_space<vmem>>, vector<8x128xf32>,
    } else {
    }
    %c0 = arith.constant 0 : index
    %c0_1 = arith.constant 0 : index
    %c0_2 = arith.constant 0 : index
    %3 = vector.load %arg1[%c0, %c0_1, %c0_2] : memref<1x32x32xbf16, #tpu.memory_space<vmem>>, vector<1x32x32xbf16>
    %4 = vector.shape_cast %3 : vector<1x32x32xbf16> to vector<32x32xbf16>
    %c0_3 = arith.constant 0 : index
    %c0_4 = arith.constant 0 : index
    %5 = vector.load %arg10[%c0_3, %c0_4] : memref<32x512xbf16, #tpu.memory_space<vmem>>, vector<32x512xbf16>
    %cst = arith.constant dense<0.000000e+00> : vector<32x512xf32>
    %6 = tpu.matmul %4, %5, %cst {dimension_numbers = #tpu.dot_dimension_numbers<[1], [0], [0], [1], [0, 0, 1, 1], [], []>} : vector<32x32xbf16>, vector<32x512xbf16>, vector<32x512xf32> -> vector<32x512xf32>
    %c0_5 = arith.constant 0 : index
    %c0_6 = arith.constant 0 : index
    %7 = vector.load %arg5[%c0_5, %c0_6] : memref<1x512xf32, #tpu.memory_space<vmem>>, vector<1x512xf32>
    %8 = vector.broadcast %7 : vector<1x512xf32> to vector<32x512xf32>
    %9 = arith.addf %6, %8 : vector<32x512xf32>
    %c0_7 = arith.constant 0 : index
    %c0_8 = arith.constant 0 : index
    %10 = vector.load %arg13[%c0_7, %c0_8] : memref<32x512xf32, #tpu.memory_space<vmem>>, vector<32x512xf32>
    tpu.vector_store %arg13[%c0_7, %c0_8], %9 {strides = array<i32>} : memref<32x512xf32, #tpu.memory_space<vmem>>, vector<32x512xf32>,
    %c0_9 = arith.constant 0 : index
    %c0_10 = arith.constant 0 : index
    %11 = vector.load %arg11[%c0_9, %c0_10] : memref<128x512xbf16, #tpu.memory_space<vmem>>, vector<128x512xbf16>
    %c0_11 = arith.constant 0 : index
    %c0_12 = arith.constant 0 : index
    %12 = vector.load %arg15[%c0_11, %c0_12] : memref<8x128xbf16, #tpu.memory_space<vmem>>, vector<8x128xbf16>
    %c0_13 = arith.constant 0 : index
    %c0_14 = arith.constant 0 : index
    %13 = vector.load %arg16[%c0_13, %c0_14] : memref<8x128xf32, #tpu.memory_space<vmem>>, vector<8x128xf32>
    %c0_15 = arith.constant 0 : index
    %c0_16 = arith.constant 0 : index
    %14 = vector.load %arg13[%c0_15, %c0_16] : memref<32x512xf32, #tpu.memory_space<vmem>>, vector<8x512xf32>
    %cst_17 = arith.constant dense<0.000000e+00> : vector<8x512xf32>
    %15 = tpu.matmul %12, %11, %cst_17 {dimension_numbers = #tpu.dot_dimension_numbers<[1], [0], [0], [1], [0, 0, 1, 1], [], []>} : vector<8x128xbf16>, vector<128x512xbf16>, vector<8x512xf32> -> vector<8x512xf32>
    %16 = arith.addf %14, %15 : vector<8x512xf32>
    %17 = vector.extract_strided_slice %16 {offsets = [0, 0], sizes = [8, 128], strides = [1, 1]} : vector<8x512xf32> to vector<8x128xf32>
    %18 = arith.negf %17 : vector<8x128xf32>
    %19 = math.exp %18 : vector<8x128xf32>
    %cst_18 = arith.constant 1.000000e+00 : f32
    %20 = vector.broadcast %cst_18 : f32 to vector<8x128xf32>
    %21 = arith.addf %20, %19 : vector<8x128xf32>
    %22 = arith.divf %20, %21 : vector<8x128xf32>
    %23 = vector.extract_strided_slice %16 {offsets = [0, 128], sizes = [8, 128], strides = [1, 1]} : vector<8x512xf32> to vector<8x128xf32>
    %24 = arith.negf %23 : vector<8x128xf32>
    %25 = math.exp %24 : vector<8x128xf32>
    %cst_19 = arith.constant 1.000000e+00 : f32
    %26 = vector.broadcast %cst_19 : f32 to vector<8x128xf32>
    %27 = arith.addf %26, %25 : vector<8x128xf32>
    %28 = arith.divf %26, %27 : vector<8x128xf32>
    %29 = vector.extract_strided_slice %16 {offsets = [0, 256], sizes = [8, 128], strides = [1, 1]} : vector<8x512xf32> to vector<8x128xf32>
    %30 = math.tanh %29 : vector<8x128xf32>
    %31 = vector.extract_strided_slice %16 {offsets = [0, 384], sizes = [8, 128], strides = [1, 1]} : vector<8x512xf32> to vector<8x128xf32>
    %32 = arith.negf %31 : vector<8x128xf32>
    %33 = math.exp %32 : vector<8x128xf32>
    %cst_20 = arith.constant 1.000000e+00 : f32
    %34 = vector.broadcast %cst_20 : f32 to vector<8x128xf32>
    %35 = arith.addf %34, %33 : vector<8x128xf32>
    %36 = arith.divf %34, %35 : vector<8x128xf32>
    %37 = arith.mulf %28, %13 : vector<8x128xf32>
    %38 = arith.mulf %22, %30 : vector<8x128xf32>
    %39 = arith.addf %37, %38 : vector<8x128xf32>
    %40 = math.tanh %39 : vector<8x128xf32>
    %41 = arith.mulf %36, %40 : vector<8x128xf32>
    %42 = arith.truncf %41 : vector<8x128xf32> to vector<8x128xbf16>
    %c0_21 = arith.constant 0 : index
    %c0_22 = arith.constant 0 : index
    %43 = vector.load %arg14[%c0_21, %c0_22] : memref<32x128xbf16, #tpu.memory_space<vmem>>, vector<8x128xbf16>
    tpu.vector_store %arg14[%c0_21, %c0_22], %42 {strides = array<i32>} : memref<32x128xbf16, #tpu.memory_space<vmem>>, vector<8x128xbf16>,
    %c8 = arith.constant 8 : index
    %c0_23 = arith.constant 0 : index
    %44 = vector.load %arg13[%c8, %c0_23] : memref<32x512xf32, #tpu.memory_space<vmem>>, vector<8x512xf32>
    %cst_24 = arith.constant dense<0.000000e+00> : vector<8x512xf32>
    %45 = tpu.matmul %42, %11, %cst_24 {dimension_numbers = #tpu.dot_dimension_numbers<[1], [0], [0], [1], [0, 0, 1, 1], [], []>} : vector<8x128xbf16>, vector<128x512xbf16>, vector<8x512xf32> -> vector<8x512xf32>
    %46 = arith.addf %44, %45 : vector<8x512xf32>
    %47 = vector.extract_strided_slice %46 {offsets = [0, 0], sizes = [8, 128], strides = [1, 1]} : vector<8x512xf32> to vector<8x128xf32>
    %48 = arith.negf %47 : vector<8x128xf32>
    %49 = math.exp %48 : vector<8x128xf32>
    %cst_25 = arith.constant 1.000000e+00 : f32
    %50 = vector.broadcast %cst_25 : f32 to vector<8x128xf32>
    %51 = arith.addf %50, %49 : vector<8x128xf32>
    %52 = arith.divf %50, %51 : vector<8x128xf32>
    %53 = vector.extract_strided_slice %46 {offsets = [0, 128], sizes = [8, 128], strides = [1, 1]} : vector<8x512xf32> to vector<8x128xf32>
    %54 = arith.negf %53 : vector<8x128xf32>
    %55 = math.exp %54 : vector<8x128xf32>
    %cst_26 = arith.constant 1.000000e+00 : f32
    %56 = vector.broadcast %cst_26 : f32 to vector<8x128xf32>
    %57 = arith.addf %56, %55 : vector<8x128xf32>
    %58 = arith.divf %56, %57 : vector<8x128xf32>
    %59 = vector.extract_strided_slice %46 {offsets = [0, 256], sizes = [8, 128], strides = [1, 1]} : vector<8x512xf32> to vector<8x128xf32>
    %60 = math.tanh %59 : vector<8x128xf32>
    %61 = vector.extract_strided_slice %46 {offsets = [0, 384], sizes = [8, 128], strides = [1, 1]} : vector<8x512xf32> to vector<8x128xf32>
    %62 = arith.negf %61 : vector<8x128xf32>
    %63 = math.exp %62 : vector<8x128xf32>
    %cst_27 = arith.constant 1.000000e+00 : f32
    %64 = vector.broadcast %cst_27 : f32 to vector<8x128xf32>
    %65 = arith.addf %64, %63 : vector<8x128xf32>
    %66 = arith.divf %64, %65 : vector<8x128xf32>
    %67 = arith.mulf %58, %39 : vector<8x128xf32>
    %68 = arith.mulf %52, %60 : vector<8x128xf32>
    %69 = arith.addf %67, %68 : vector<8x128xf32>
    %70 = math.tanh %69 : vector<8x128xf32>
    %71 = arith.mulf %66, %70 : vector<8x128xf32>
    %72 = arith.truncf %71 : vector<8x128xf32> to vector<8x128xbf16>
    %c8_28 = arith.constant 8 : index
    %c0_29 = arith.constant 0 : index
    %73 = vector.load %arg14[%c8_28, %c0_29] : memref<32x128xbf16, #tpu.memory_space<vmem>>, vector<8x128xbf16>
    tpu.vector_store %arg14[%c8_28, %c0_29], %72 {strides = array<i32>} : memref<32x128xbf16, #tpu.memory_space<vmem>>, vector<8x128xbf16>,
    %c16 = arith.constant 16 : index
    %c0_30 = arith.constant 0 : index
    %74 = vector.load %arg13[%c16, %c0_30] : memref<32x512xf32, #tpu.memory_space<vmem>>, vector<8x512xf32>
    %cst_31 = arith.constant dense<0.000000e+00> : vector<8x512xf32>
    %75 = tpu.matmul %72, %11, %cst_31 {dimension_numbers = #tpu.dot_dimension_numbers<[1], [0], [0], [1], [0, 0, 1, 1], [], []>} : vector<8x128xbf16>, vector<128x512xbf16>, vector<8x512xf32> -> vector<8x512xf32>
    %76 = arith.addf %74, %75 : vector<8x512xf32>
    %77 = vector.extract_strided_slice %76 {offsets = [0, 0], sizes = [8, 128], strides = [1, 1]} : vector<8x512xf32> to vector<8x128xf32>
    %78 = arith.negf %77 : vector<8x128xf32>
    %79 = math.exp %78 : vector<8x128xf32>
    %cst_32 = arith.constant 1.000000e+00 : f32
    %80 = vector.broadcast %cst_32 : f32 to vector<8x128xf32>
    %81 = arith.addf %80, %79 : vector<8x128xf32>
    %82 = arith.divf %80, %81 : vector<8x128xf32>
    %83 = vector.extract_strided_slice %76 {offsets = [0, 128], sizes = [8, 128], strides = [1, 1]} : vector<8x512xf32> to vector<8x128xf32>
    %84 = arith.negf %83 : vector<8x128xf32>
    %85 = math.exp %84 : vector<8x128xf32>
    %cst_33 = arith.constant 1.000000e+00 : f32
    %86 = vector.broadcast %cst_33 : f32 to vector<8x128xf32>
    %87 = arith.addf %86, %85 : vector<8x128xf32>
    %88 = arith.divf %86, %87 : vector<8x128xf32>
    %89 = vector.extract_strided_slice %76 {offsets = [0, 256], sizes = [8, 128], strides = [1, 1]} : vector<8x512xf32> to vector<8x128xf32>
    %90 = math.tanh %89 : vector<8x128xf32>
    %91 = vector.extract_strided_slice %76 {offsets = [0, 384], sizes = [8, 128], strides = [1, 1]} : vector<8x512xf32> to vector<8x128xf32>
    %92 = arith.negf %91 : vector<8x128xf32>
    %93 = math.exp %92 : vector<8x128xf32>
    %cst_34 = arith.constant 1.000000e+00 : f32
    %94 = vector.broadcast %cst_34 : f32 to vector<8x128xf32>
    %95 = arith.addf %94, %93 : vector<8x128xf32>
    %96 = arith.divf %94, %95 : vector<8x128xf32>
    %97 = arith.mulf %88, %69 : vector<8x128xf32>
    %98 = arith.mulf %82, %90 : vector<8x128xf32>
    %99 = arith.addf %97, %98 : vector<8x128xf32>
    %100 = math.tanh %99 : vector<8x128xf32>
    %101 = arith.mulf %96, %100 : vector<8x128xf32>
    %102 = arith.truncf %101 : vector<8x128xf32> to vector<8x128xbf16>
    %c16_35 = arith.constant 16 : index
    %c0_36 = arith.constant 0 : index
    %103 = vector.load %arg14[%c16_35, %c0_36] : memref<32x128xbf16, #tpu.memory_space<vmem>>, vector<8x128xbf16>
    tpu.vector_store %arg14[%c16_35, %c0_36], %102 {strides = array<i32>} : memref<32x128xbf16, #tpu.memory_space<vmem>>, vector<8x128xbf16>,
    %c24 = arith.constant 24 : index
    %c0_37 = arith.constant 0 : index
    %104 = vector.load %arg13[%c24, %c0_37] : memref<32x512xf32, #tpu.memory_space<vmem>>, vector<8x512xf32>
    %cst_38 = arith.constant dense<0.000000e+00> : vector<8x512xf32>
    %105 = tpu.matmul %102, %11, %cst_38 {dimension_numbers = #tpu.dot_dimension_numbers<[1], [0], [0], [1], [0, 0, 1, 1], [], []>} : vector<8x128xbf16>, vector<128x512xbf16>, vector<8x512xf32> -> vector<8x512xf32>
    %106 = arith.addf %104, %105 : vector<8x512xf32>
    %107 = vector.extract_strided_slice %106 {offsets = [0, 0], sizes = [8, 128], strides = [1, 1]} : vector<8x512xf32> to vector<8x128xf32>
    %108 = arith.negf %107 : vector<8x128xf32>
    %109 = math.exp %108 : vector<8x128xf32>
    %cst_39 = arith.constant 1.000000e+00 : f32
    %110 = vector.broadcast %cst_39 : f32 to vector<8x128xf32>
    %111 = arith.addf %110, %109 : vector<8x128xf32>
    %112 = arith.divf %110, %111 : vector<8x128xf32>
    %113 = vector.extract_strided_slice %106 {offsets = [0, 128], sizes = [8, 128], strides = [1, 1]} : vector<8x512xf32> to vector<8x128xf32>
    %114 = arith.negf %113 : vector<8x128xf32>
    %115 = math.exp %114 : vector<8x128xf32>
    %cst_40 = arith.constant 1.000000e+00 : f32
    %116 = vector.broadcast %cst_40 : f32 to vector<8x128xf32>
    %117 = arith.addf %116, %115 : vector<8x128xf32>
    %118 = arith.divf %116, %117 : vector<8x128xf32>
    %119 = vector.extract_strided_slice %106 {offsets = [0, 256], sizes = [8, 128], strides = [1, 1]} : vector<8x512xf32> to vector<8x128xf32>
    %120 = math.tanh %119 : vector<8x128xf32>
    %121 = vector.extract_strided_slice %106 {offsets = [0, 384], sizes = [8, 128], strides = [1, 1]} : vector<8x512xf32> to vector<8x128xf32>
    %122 = arith.negf %121 : vector<8x128xf32>
    %123 = math.exp %122 : vector<8x128xf32>
    %cst_41 = arith.constant 1.000000e+00 : f32
    %124 = vector.broadcast %cst_41 : f32 to vector<8x128xf32>
    %125 = arith.addf %124, %123 : vector<8x128xf32>
    %126 = arith.divf %124, %125 : vector<8x128xf32>
    %127 = arith.mulf %118, %99 : vector<8x128xf32>
    %128 = arith.mulf %112, %120 : vector<8x128xf32>
    %129 = arith.addf %127, %128 : vector<8x128xf32>
    %130 = math.tanh %129 : vector<8x128xf32>
    %131 = arith.mulf %126, %130 : vector<8x128xf32>
    %132 = arith.truncf %131 : vector<8x128xf32> to vector<8x128xbf16>
    %c24_42 = arith.constant 24 : index
    %c0_43 = arith.constant 0 : index
    %133 = vector.load %arg14[%c24_42, %c0_43] : memref<32x128xbf16, #tpu.memory_space<vmem>>, vector<8x128xbf16>
    tpu.vector_store %arg14[%c24_42, %c0_43], %132 {strides = array<i32>} : memref<32x128xbf16, #tpu.memory_space<vmem>>, vector<8x128xbf16>,
    %c0_44 = arith.constant 0 : index
    %c0_45 = arith.constant 0 : index
    %134 = vector.load %arg15[%c0_44, %c0_45] : memref<8x128xbf16, #tpu.memory_space<vmem>>, vector<8x128xbf16>
    tpu.vector_store %arg15[%c0_44, %c0_45], %132 {strides = array<i32>} : memref<8x128xbf16, #tpu.memory_space<vmem>>, vector<8x128xbf16>,
    %c0_46 = arith.constant 0 : index
    %c0_47 = arith.constant 0 : index
    %135 = vector.load %arg16[%c0_46, %c0_47] : memref<8x128xf32, #tpu.memory_space<vmem>>, vector<8x128xf32>
    tpu.vector_store %arg16[%c0_46, %c0_47], %129 {strides = array<i32>} : memref<8x128xf32, #tpu.memory_space<vmem>>, vector<8x128xf32>,
    %c0_48 = arith.constant 0 : index
    %c0_49 = arith.constant 0 : index
    %136 = vector.load %arg14[%c0_48, %c0_49] : memref<32x128xbf16, #tpu.memory_space<vmem>>, vector<32x128xbf16>
    %c0_50 = arith.constant 0 : index
    %c0_51 = arith.constant 0 : index
    %137 = vector.load %arg12[%c0_50, %c0_51] : memref<128x128xbf16, #tpu.memory_space<vmem>>, vector<128x128xbf16>
    %cst_52 = arith.constant dense<0.000000e+00> : vector<32x128xf32>
    %138 = tpu.matmul %136, %137, %cst_52 {dimension_numbers = #tpu.dot_dimension_numbers<[1], [0], [0], [1], [0, 0, 1, 1], [], []>} : vector<32x128xbf16>, vector<128x128xbf16>, vector<32x128xf32> -> vector<32x128xf32>
    %c0_53 = arith.constant 0 : index
    %c0_54 = arith.constant 0 : index
    %139 = vector.load %arg6[%c0_53, %c0_54] : memref<1x128xf32, #tpu.memory_space<vmem>>, vector<1x128xf32>
    %140 = vector.broadcast %139 : vector<1x128xf32> to vector<32x128xf32>
    %141 = arith.addf %138, %140 : vector<32x128xf32>
    %cst_55 = arith.constant dense<0xFF800000> : vector<32xf32>
    %142 = vector.multi_reduction <maximumf>, %141, %cst_55 [1] : vector<32x128xf32> to vector<32xf32>
    %143 = vector.shape_cast %142 : vector<32xf32> to vector<32x1xf32>
    %144 = vector.broadcast %143 : vector<32x1xf32> to vector<32x128xf32>
    %145 = arith.subf %141, %144 : vector<32x128xf32>
    %146 = math.exp %145 : vector<32x128xf32>
    %cst_56 = arith.constant dense<0.000000e+00> : vector<32xf32>
    %147 = vector.multi_reduction <add>, %146, %cst_56 [1] : vector<32x128xf32> to vector<32xf32>
    %148 = vector.shape_cast %147 : vector<32xf32> to vector<32x1xf32>
    %149 = math.log %148 : vector<32x1xf32>
    %150 = arith.addf %143, %149 : vector<32x1xf32>
    %c0_57 = arith.constant 0 : index
    %c0_58 = arith.constant 0 : index
    %c0_59 = arith.constant 0 : index
    %151 = vector.load %arg7[%c0_57, %c0_58, %c0_59] : memref<1x32x1xi32, #tpu.memory_space<vmem>>, vector<1x32x1xi32>
    %152 = vector.shape_cast %151 : vector<1x32x1xi32> to vector<32x1xi32>
    %153 = tpu.iota {dimensions = array<i32: 1>} : vector<32x128xi32>
    %154 = vector.broadcast %152 : vector<32x1xi32> to vector<32x128xi32>
    %155 = arith.cmpi eq, %153, %154 : vector<32x128xi32>
    %cst_60 = arith.constant 0.000000e+00 : f32
    %156 = vector.broadcast %cst_60 : f32 to vector<32x128xf32>
    %157 = arith.select %155, %141, %156 : vector<32x128xi1>, vector<32x128xf32>
    %cst_61 = arith.constant dense<0.000000e+00> : vector<32xf32>
    %158 = vector.multi_reduction <add>, %157, %cst_61 [1] : vector<32x128xf32> to vector<32xf32>
    %159 = vector.shape_cast %158 : vector<32xf32> to vector<32x1xf32>
    %160 = arith.subf %150, %159 : vector<32x1xf32>
    %c0_62 = arith.constant 0 : index
    %c0_63 = arith.constant 0 : index
    %c0_64 = arith.constant 0 : index
    %161 = vector.load %arg8[%c0_62, %c0_63, %c0_64] : memref<1x32x1xf32, #tpu.memory_space<vmem>>, vector<1x32x1xf32>
    %162 = vector.shape_cast %161 : vector<1x32x1xf32> to vector<32x1xf32>
    %163 = arith.mulf %160, %162 : vector<32x1xf32>
    %cst_65 = arith.constant 0.000000e+00 : f32
    %164 = vector.broadcast %cst_65 : f32 to vector<8x1xf32>
    %165 = vector.extract_strided_slice %163 {offsets = [0, 0], sizes = [8, 1], strides = [1, 1]} : vector<32x1xf32> to vector<8x1xf32>
    %166 = arith.addf %164, %165 : vector<8x1xf32>
    %167 = vector.extract_strided_slice %163 {offsets = [8, 0], sizes = [8, 1], strides = [1, 1]} : vector<32x1xf32> to vector<8x1xf32>
    %168 = arith.addf %166, %167 : vector<8x1xf32>
    %169 = vector.extract_strided_slice %163 {offsets = [16, 0], sizes = [8, 1], strides = [1, 1]} : vector<32x1xf32> to vector<8x1xf32>
    %170 = arith.addf %168, %169 : vector<8x1xf32>
    %171 = vector.extract_strided_slice %163 {offsets = [24, 0], sizes = [8, 1], strides = [1, 1]} : vector<32x1xf32> to vector<8x1xf32>
    %172 = arith.addf %170, %171 : vector<8x1xf32>
    %173 = tpu.iota {dimensions = array<i32: 0>} : vector<8x8xi32>
    %174 = tpu.iota {dimensions = array<i32: 1>} : vector<8x8xi32>
    %175 = arith.cmpi eq, %173, %174 : vector<8x8xi32>
    %cst_66 = arith.constant 0.000000e+00 : f32
    %176 = vector.shape_cast %172 : vector<8x1xf32> to vector<8x1xf32>
    %177 = vector.broadcast %176 : vector<8x1xf32> to vector<8x8xf32>
    %178 = vector.broadcast %cst_66 : f32 to vector<8x8xf32>
    %179 = arith.select %175, %177, %178 : vector<8x8xi1>, vector<8x8xf32>
    %cst_67 = arith.constant dense<0.000000e+00> : vector<8xf32>
    %180 = vector.multi_reduction <add>, %179, %cst_67 [0] : vector<8x8xf32> to vector<8xf32>
    %181 = vector.shape_cast %180 : vector<8xf32> to vector<1x8xf32>
    %c0_68 = arith.constant 0 : index
    %c0_69 = arith.constant 0 : index
    %c0_70 = arith.constant 0 : index
    %182 = vector.load %arg9[%c0_68, %c0_69, %c0_70] : memref<1x1x8xf32, #tpu.memory_space<vmem>>, vector<1x1x8xf32>
    %183 = vector.shape_cast %182 : vector<1x1x8xf32> to vector<1x8xf32>
    %184 = vector.shape_cast %181 : vector<1x8xf32> to vector<1x1x8xf32>
    tpu.vector_store %arg9[%c0_68, %c0_69, %c0_70], %184 {strides = array<i32>} : memref<1x1x8xf32, #tpu.memory_space<vmem>>, vector<1x1x8xf32>,
    return
  }
  func.func @transform_0(%arg0: i32) -> (i32, i32, i32) {
    %c0_i32 = arith.constant 0 : i32
    %c0_i32_0 = arith.constant 0 : i32
    %c0_i32_1 = arith.constant 0 : i32
    return %arg0, %c0_i32, %c0_i32_0 : i32, i32, i32
  }
  func.func @transform_4(%arg0: i32) -> (i32, i32) {
    %c0_i32 = arith.constant 0 : i32
    %c0_i32_0 = arith.constant 0 : i32
    %c0_i32_1 = arith.constant 0 : i32
    return %c0_i32, %c0_i32_0 : i32, i32
  }
  func.func @transform_5(%arg0: i32) -> (i32, i32) {
    %c0_i32 = arith.constant 0 : i32
    %c0_i32_0 = arith.constant 0 : i32
    %c0_i32_1 = arith.constant 0 : i32
    return %c0_i32, %c0_i32_0 : i32, i32
  }
  func.func @transform_6(%arg0: i32) -> (i32, i32, i32) {
    %c0_i32 = arith.constant 0 : i32
    %c0_i32_0 = arith.constant 0 : i32
    %c0_i32_1 = arith.constant 0 : i32
    return %arg0, %c0_i32, %c0_i32_0 : i32, i32, i32
  }
  func.func @transform_7(%arg0: i32) -> (i32, i32, i32) {
    %c0_i32 = arith.constant 0 : i32
    %c0_i32_0 = arith.constant 0 : i32
    %c0_i32_1 = arith.constant 0 : i32
    return %arg0, %c0_i32, %c0_i32_0 : i32, i32, i32
  }
  func.func @transform_8(%arg0: i32) -> (i32, i32, i32) {
    %c0_i32 = arith.constant 0 : i32
    %c0_i32_0 = arith.constant 0 : i32
    %c0_i32_1 = arith.constant 0 : i32
    return %arg0, %c0_i32, %c0_i32_0 : i32, i32, i32
  }
}

</mosaic_0001>

<bundles_post_ra>
// kernel: tpu_custom_call.1
= control target key start
LH: loop header
LB: loop body
LE: loop exit
PB: predicated region body
PF: predicated region fallthrough
CT: control target
= control target key end

     0   :  { %s2595_s0 = inlined_call_operand.vmem [shape: bf16[3,32,32], index: 0, kind: input, shape index: {}]   ;;  %s2596_s1 = inlined_call_operand.vmem [shape: bf16[32,512], index: 1, kind: input, shape index: {}]   ;;  %s2597_s2 = inlined_call_operand.hbm [shape: bf16[128,512], index: 2, kind: input, shape index: {}]   ;;  %s2598_s3 = inlined_call_operand.vmem [shape: bf16[128,128], index: 3, kind: input, shape index: {}]   ;;  %s2599_s4 = inlined_call_operand.vmem [shape: f32[1,512], index: 4, kind: input, shape index: {}]   ;;  %s2600_s5 = inlined_call_operand.vmem [shape: f32[1,128], index: 5, kind: input, shape index: {}]   ;;  %s2601_s6 = inlined_call_operand.vmem [shape: s32[3,32,1], index: 6, kind: input, shape index: {}]   ;;  %s2602_s7 = inlined_call_operand.vmem [shape: f32[3,32,1], index: 7, kind: input, shape index: {}]   ;;  %s2603_s8 = inlined_call_operand.hbm [shape: f32[3,1,8], index: 8, kind: output, shape index: {}]  }
   0x1   :  { %2605 = sst [smem:[#allocation27_spill]] %s2595_s0 }
   0x2   :  { %2606 = sst [smem:[#allocation28_spill]] %s2596_s1 }
   0x3   :  { %2607 = sst [smem:[#allocation29_spill]] %s2601_s6 }
   0x4   :  { %13 = vsyncpa [#allocation11], 0 }
   0x5   :  { %15 = vsyncpa [#allocation11 + $0x1], 0  ;;  %s2130_s27 = smov 0   ;;  %s2132_s28 = smov 0  }
   0x6   :  { %s2134_s29 = smov 0   ;;  %s2136_s30 = smov 0  }
   0x7 LB: > { %s2151_s9 = sadd.s32 4294967295, %s2079_s30   ;;  %s1561_s10 = sadd.s32 4294967294, %s2079_s30   ;;  %s2079_s30 = sphi %s2136_s30, %s2627_s30   ;;  %s2075_s29 = sphi %s2134_s29, %s2626_s29   ;;  %s2071_s28 = sphi %s2132_s28, %s2625_s28   ;;  %s2067_s27 = sphi %s2130_s27, %s2624_s27  }
   0x8   : > { %s2155_s11 = sadd.s32 1, %s2079_s30   ;;  %s148_s12 = sadd.s32 1, %s2075_s29 }
   0x9   : > { %s145_s13 = ssub.s32 %s2079_s30, %s2155_s11  ;;  %p158_p0 = scmp.ne.s32.totalorder %s2075_s29, %s2071_s28 }
   0xa   : > { %p146_p1 = scmp.eq.s32.totalorder %s145_s13, 0  ;;  %p159_p2 = scmp.eq.s32.totalorder %s2151_s9, 2 }
   0xb   : > { %p164_p3 = scmp.ne.s32.totalorder %s2071_s28, %s2067_s27  ;;  %p165_p4 = scmp.eq.s32.totalorder %s1561_s10, 2 }
   0xc   : > { %s2166_s14 = scalar_select %p146_p1, %s2075_s29, %s148_s12  }
   0xd   : > { %p2168_p5 = por %p159_p2, %p158_p0  ;;  %p2172_p6 = por %p165_p4, %p164_p3 }
   0xe   : > { %2608 = sst [smem:[#allocation22_spill]] %s2166_s14  ;;  %p1564_p7 = scmp.ge.s32.totalorder %s2079_s30, 1 }
   0xf   : > { %p213_p8 = scmp.lt.s32.totalorder %s2079_s30, 4 }
  0x11   : > { %p214_p9 = pnand %p1564_p7, %p213_p8 }
  0x13   : > { %217 = sbr.rel (%p214_p9) target bundleno = 1343 (0x53f), region = 40 }
  0x18   : > { %s2604_s17 = sand.u32 1, %s2071_s28   ;;  %p250_p10 = scmp.lt.s32.totalorder %s2151_s9, 2 }
  0x19   : > { %s2611_s0 = sld [smem:[#allocation27_spill]]  ;;  %s2198_s14 = scalar_lea.vmem [#allocation10], %s2604_s17 }
  0x1a   : > { %s251_s18 = scalar_select %p250_p10, %s2151_s9, 2 }
  0x1b   : > { %s2612_s6 = sld [smem:[#allocation29_spill]]  ;;  %p1571_p11 = scmp.ne.s32.totalorder %s2151_s9, 0 }
  0x1c   : > { %s1805_s19 = sshll.u32 %s251_s18, 4  ;;  %s1806_s20 = sshll.u32 %s251_s18, 5 }
  0x1d   : > { %s2194_s13 = scalar_lea.vmem %s2602_s7, %s1806_s20  ;;  %269 = sbr.rel (%p1571_p11) target bundleno = 63 (0x3f), region = 44 }
  0x1e   : > { %s2613_s1 = sld [smem:[#allocation28_spill]] (!%p1571_p11) }
  0x1f   : > { %s2184_s23 = scalar_lea.vmem %s2611_s0, %s1805_s19 }
  0x21   : > { %s2189_s26 = scalar_lea.vmem %s2612_s6, %s1806_s20 }
  0x24   : > { %v280_v0 = vld [vmem:[%s2613_s1] sm:$0xff]  ;;  %v282_v1 = vld [vmem:[%s2613_s1 + $0x8] sm:$0xff]  ;;  %v284_v2 = vld [vmem:[%s2613_s1 + $0x10] sm:$0xff] }
  0x25   : > { %281 = vst [vmem:[#allocation2] sm:$0xff] %v280_v0  ;;  %v286_v3 = vld [vmem:[%s2613_s1 + $0x18] sm:$0xff]  ;;  %v288_v4 = vld [vmem:[%s2613_s1 + $0x20] sm:$0xff]  ;;  %v290_v5 = vld [vmem:[%s2613_s1 + $0x28] sm:$0xff] }
  0x26   : > { %283 = vst [vmem:[#allocation2 + $0x8] sm:$0xff] %v282_v1  ;;  %v292_v6 = vld [vmem:[%s2613_s1 + $0x30] sm:$0xff]  ;;  %v294_v7 = vld [vmem:[%s2613_s1 + $0x38] sm:$0xff] }
  0x27   : > { %285 = vst [vmem:[#allocation2 + $0x10] sm:$0xff] %v284_v2 }
  0x28   : > { %287 = vst [vmem:[#allocation2 + $0x18] sm:$0xff] %v286_v3 }
  0x29   : > { %289 = vst [vmem:[#allocation2 + $0x20] sm:$0xff] %v288_v4 }
  0x2a   : > { %291 = vst [vmem:[#allocation2 + $0x28] sm:$0xff] %v290_v5 }
  0x2b   : > { %293 = vst [vmem:[#allocation2 + $0x30] sm:$0xff] %v292_v6 }
  0x2c   : > { %295 = vst [vmem:[#allocation2 + $0x38] sm:$0xff] %v294_v7 }
  0x2d   : > { %301 = vsyncadd [#allocation9], 1024  ;;  %s310_s10 = sshll.u32 %s2597_s2, 4  ;;  %v327_v8 = vld [vmem:[%s2598_s3] sm:$0xff]  ;;  %v329_v9 = vld [vmem:[%s2598_s3 + $0x8] sm:$0xff]  ;;  %s2081_s22 = smov [#allocation3]   ;;  %s311_s10 = int_to_ptr.hbm [resolvable:$true] %s310_s10 }
  0x2e   : > { %s312_s24 = sshll.u32 %s2081_s22, 4  ;;  %328 = vst [vmem:[#allocation4 + $0x30] sm:$0xff] %v327_v8  ;;  %v331_v10 = vld [vmem:[%s2598_s3 + $0x10] sm:$0xff]  ;;  %v333_v11 = vld [vmem:[%s2598_s3 + $0x18] sm:$0xff]  ;;  %v335_v12 = vld [vmem:[%s2598_s3 + $0x20] sm:$0xff]  ;;  %s313_s24 = int_to_ptr.vmem [resolvable:$true] %s312_s24 }
  0x2f   : > { %330 = vst [vmem:[#allocation4] sm:$0xff] %v329_v9  ;;  %315 = dma.hbm_to_vmem [thread:$0]  %s311_s10, 4096, %s313_s24, [#allocation9 + $0x1]  ;;  %v337_v13 = vld [vmem:[%s2598_s3 + $0x28] sm:$0xff]  ;;  %v339_v14 = vld [vmem:[%s2598_s3 + $0x30] sm:$0xff]  ;;  %v341_v15 = vld [vmem:[%s2598_s3 + $0x38] sm:$0xff] }
  0x30   : > { %332 = vst [vmem:[#allocation4 + $0x18] sm:$0xff] %v331_v10 }
  0x31   : > { %334 = vst [vmem:[#allocation4 + $0x10] sm:$0xff] %v333_v11 }
  0x32   : > { %336 = vst [vmem:[#allocation4 + $0x8] sm:$0xff] %v335_v12 }
  0x33   : > { %338 = vst [vmem:[#allocation4 + $0x20] sm:$0xff] %v337_v13 }
  0x34   : > { %340 = vst [vmem:[#allocation4 + $0x28] sm:$0xff] %v339_v14 }
  0x35   : > { %342 = vst [vmem:[#allocation4 + $0x38] sm:$0xff] %v341_v15 }
  0x36   : > { %348 = vsyncadd [#allocation9 + $0x2], 1024 }
  0x37   : > { %2055 = dma.done.wait [#allocation9], 1024 }
  0x38   : > { %2056 = vsyncadd [#allocation9], 4294966272 }
  0x39   : > { %2057 = dma.done.wait [#allocation9 + $0x1], 4096 }
  0x3a   : > { %2058 = vsyncadd [#allocation9 + $0x1], 4294963200 }
  0x3b   : > { %2059 = dma.done.wait [#allocation9 + $0x2], 1024 }
  0x3c   : > { %2060 = vsyncadd [#allocation9 + $0x2], 4294966272  ;;  %v2082_v16 = vmov 0   ;;  %v2083_v17 = vmov 0.0  }
  0x3d   : > { %360 = vst [vmem:[#allocation7] sm:$0xf] %v2082_v16 }
  0x3e   : > { %361 = vst [vmem:[#allocation8] sm:$0xff] %v2083_v17 }
  0x3f PF: > { %v1814_v18 = vld [vmem:[#allocation2 + $0x24] sm:$0xf]  ;;  %v1600_v19 = vld [vmem:[#allocation2 + $0x30] sm:$0xf0]  ;;  %v1815_v20 = vld [vmem:[#allocation2 + $0x2c] sm:$0xf]  ;;  %s1450_s24 = scalar_lea.hbm %s2603_s8, %s2151_s9 }
  0x40   : > { %v1603_v21 = vor.u32 %v1814_v18, %v1600_v19  ;;  %v1608_v22 = vld [vmem:[#allocation2 + $0x38] sm:$0xf0]  ;;  %v1810_v23 = vld [vmem:[#allocation2 + $0x4] sm:$0xf]  ;;  %v1584_v24 = vld [vmem:[#allocation2 + $0x10] sm:$0xf0] }
  0x41   : > { %v1611_v25 = vor.u32 %v1815_v20, %v1608_v22  ;;  %v1811_v26 = vld [vmem:[#allocation2 + $0xc] sm:$0xf]  ;;  %v1592_v27 = vld [vmem:[#allocation2 + $0x18] sm:$0xf0]  ;;  %v1734_v28 = vld [vmem:[#allocation3 + $0xe0] sm:$0xf]  ;;  %v1587_v29 = vor.u32 %v1810_v23, %v1584_v24 }
  0x42   : > { %466 = vmatpush.bf16.msra.mxu1 %v1603_v21  ;;  %v1848_v30 = vld [vmem:[#allocation3 + $0xec] sm:$0xf0]  ;;  %v1847_v31 = vld [vmem:[#allocation3 + $0xec] sm:$0xf]  ;;  %v1595_v32 = vor.u32 %v1811_v26, %v1592_v27  ;;  %v1744_v34 = vld [vmem:[#allocation3 + $0xf8] sm:$0xf0] }
  0x43   : > { %504 = vmatpush.bf16.msra.mxu3 %v1611_v25  ;;  %v2252_v33 = vor.u32 %v1848_v30, %v1734_v28  ;;  %v1718_v35 = vld [vmem:[#allocation3 + $0xc0] sm:$0xf]  ;;  %v2254_v36 = vor.u32 %v1847_v31, %v1744_v34  ;;  %v1844_v37 = vld [vmem:[#allocation3 + $0xcc] sm:$0xf0]  ;;  %v1606_v38 = vld [vmem:[#allocation2 + $0x28] sm:$0xf] }
  0x44   : > { %v1817_v39 = vld [vmem:[#allocation2 + $0x34] sm:$0xf0]  ;;  %v2257_v40 = vld [vmem:[%s2184_s23] sm:$0xff]  ;;  %v1843_v42 = vld [vmem:[#allocation3 + $0xcc] sm:$0xf]  ;;  %vm434_vm0 = vcmask 261120   ;;  %v2260_v46 = vor.u32 %v1844_v37, %v1718_v35 }
  0x45   : > { %v1607_v41 = vor.u32 %v1817_v39, %v1606_v38  ;;  %v1728_v43 = vld [vmem:[#allocation3 + $0xd8] sm:$0xf0]  ;;  %v1590_v44 = vld [vmem:[#allocation2 + $0x8] sm:$0xf]  ;;  %v1813_v45 = vld [vmem:[#allocation2 + $0x14] sm:$0xf0] }
  0x46   : > { %467 = vmatpush.bf16.msra.mxu1 %v1587_v29  ;;  %v1702_v47 = vld [vmem:[#allocation3 + $0xa0] sm:$0xf]  ;;  %v2263_v48 = vor.u32 %v1843_v42, %v1728_v43  ;;  %v1840_v49 = vld [vmem:[#allocation3 + $0xac] sm:$0xf0]  ;;  %v1591_v50 = vor.u32 %v1813_v45, %v1590_v44  ;;  %v1742_v51 = vld [vmem:[#allocation3 + $0xe8] sm:$0xf] }
  0x47   : > { %505 = vmatpush.bf16.msra.mxu3 %v1595_v32  ;;  %485 = vmatpush.bf16.msra.mxu2 %v1607_v41  ;;  %v1849_v52 = vld [vmem:[#allocation3 + $0xf4] sm:$0xf0]  ;;  %v1839_v53 = vld [vmem:[#allocation3 + $0xac] sm:$0xf]  ;;  %v1712_v54 = vld [vmem:[#allocation3 + $0xb8] sm:$0xf0]  ;;  %v2272_v58 = vor.u32 %v1840_v49, %v1702_v47 }
  0x48   : > { %v2267_v55 = vor.u32 %v1849_v52, %v1742_v51  ;;  %v1726_v56 = vld [vmem:[#allocation3 + $0xc8] sm:$0xf]  ;;  %v1845_v57 = vld [vmem:[#allocation3 + $0xd4] sm:$0xf0]  ;;  %v2275_v59 = vor.u32 %v1839_v53, %v1712_v54  ;;  %v1686_v60 = vld [vmem:[#allocation3 + $0x80] sm:$0xf] }
  0x49   : > { %1614 = vmatmul.msk.bf16.vlgmr.msra.gmra.mxu1 %vm434_vm0, %v2257_v40  ;;  %v1836_v61 = vld [vmem:[#allocation3 + $0x8c] sm:$0xf0]  ;;  %v1835_v62 = vld [vmem:[#allocation3 + $0x8c] sm:$0xf]  ;;  %v1696_v63 = vld [vmem:[#allocation3 + $0x98] sm:$0xf0]  ;;  %v2278_v0 = vor.u32 %v1845_v57, %v1726_v56 }
  0x4a   : > { %731 = vmatpush.bf16.msrb.mxu1 %v2252_v33  ;;  %1618 = vmatmul.msk.bf16.vlgmr.msra.gmra.mxu3 %vm434_vm0, %v2257_v40  ;;  %v1710_v1 = vld [vmem:[#allocation3 + $0xa8] sm:$0xf]  ;;  %v1841_v2 = vld [vmem:[#allocation3 + $0xb4] sm:$0xf0]  ;;  %v1598_v3 = vld [vmem:[#allocation2 + $0x20] sm:$0xf]  ;;  %v2281_v5 = vor.u32 %v1836_v61, %v1686_v60  ;;  %v2286_v7 = vor.u32 %v1835_v62, %v1696_v63 }
  0x4b   : > { %770 = vmatpush.bf16.msrb.mxu3 %v2254_v36  ;;  %486 = vmatpush.bf16.msra.mxu2 %v1591_v50  ;;  %v1816_v4 = vld [vmem:[#allocation2 + $0x2c] sm:$0xf0]  ;;  %v1670_v8 = vld [vmem:[#allocation3 + $0x60] sm:$0xf]  ;;  %v1831_v10 = vld [vmem:[#allocation3 + $0x6c] sm:$0xf]  ;;  %v2289_v12 = vor.u32 %v1841_v2, %v1710_v1 }
  0x4c   : > { %v1599_v6 = vor.u32 %v1816_v4, %v1598_v3  ;;  %v1832_v9 = vld [vmem:[#allocation3 + $0x6c] sm:$0xf0]  ;;  %v1680_v11 = vld [vmem:[#allocation3 + $0x78] sm:$0xf0]  ;;  %v1582_v13 = vld [vmem:[#allocation2] sm:$0xf] }
  0x4d   : > { %v1812_v14 = vld [vmem:[#allocation2 + $0xc] sm:$0xf0]  ;;  %v1694_v15 = vld [vmem:[#allocation3 + $0x88] sm:$0xf]  ;;  %v1837_v16 = vld [vmem:[#allocation3 + $0x94] sm:$0xf0]  ;;  %v2292_v18 = vor.u32 %v1832_v9, %v1670_v8  ;;  %v2295_v19 = vor.u32 %v1831_v10, %v1680_v11 }
  0x4e   : > { %732 = vmatpush.bf16.msrb.mxu1 %v2260_v46  ;;  %1616 = vmatmul.msk.bf16.vlgmr.msra.gmra.mxu2 %vm434_vm0, %v2257_v40  ;;  %v1583_v17 = vor.u32 %v1812_v14, %v1582_v13  ;;  %v1654_v20 = vld [vmem:[#allocation3 + $0x40] sm:$0xf]  ;;  %v1828_v21 = vld [vmem:[#allocation3 + $0x4c] sm:$0xf0]  ;;  %v2298_v22 = vld [vmem:[%s2184_s23 + $0x8] sm:$0xff]  ;;  %v2301_v25 = vor.u32 %v1837_v16, %v1694_v15  ;;  %s1452_s25 = sshll.u32 %s2198_s14, 4  ;;  %s1453_s25 = int_to_ptr.vmem [resolvable:$true] %s1452_s25 }
  0x4f   : > { %771 = vmatpush.bf16.msrb.mxu3 %v2263_v48  ;;  %757 = vmatpush.bf16.msrb.mxu2 %v2267_v55  ;;  %v1827_v23 = vld [vmem:[#allocation3 + $0x4c] sm:$0xf]  ;;  %v1664_v24 = vld [vmem:[#allocation3 + $0x58] sm:$0xf0]  ;;  %v1678_v26 = vld [vmem:[#allocation3 + $0x68] sm:$0xf]  ;;  %v2305_v28 = vor.u32 %v1828_v21, %v1654_v20 }
  0x50   : > { %447 = vmatpush.bf16.msra.mxu0 %v1599_v6  ;;  %v1833_v27 = vld [vmem:[#allocation3 + $0x74] sm:$0xf0]  ;;  %v2308_v29 = vor.u32 %v1827_v23, %v1664_v24  ;;  %v1638_v30 = vld [vmem:[#allocation3 + $0x20] sm:$0xf]  ;;  %v1824_v31 = vld [vmem:[#allocation3 + $0x2c] sm:$0xf0] }
  0x51   : > { %v1823_v32 = vld [vmem:[#allocation3 + $0x2c] sm:$0xf]  ;;  %v1648_v34 = vld [vmem:[#allocation3 + $0x38] sm:$0xf0]  ;;  %v2315_v35 = vor.u32 %v1833_v27, %v1678_v26  ;;  %v1662_v37 = vld [vmem:[#allocation3 + $0x48] sm:$0xf]  ;;  %v2321_v39 = vor.u32 %v1824_v31, %v1638_v30 }
  0x52   : > { %733 = vmatpush.bf16.msrb.mxu1 %v2272_v58  ;;  %v1829_v38 = vld [vmem:[#allocation3 + $0x54] sm:$0xf0]  ;;  %v1622_v41 = vld [vmem:[#allocation3] sm:$0xf]  ;;  %v1820_v42 = vld [vmem:[#allocation3 + $0xc] sm:$0xf0] }
  0x53   : > { %772 = vmatpush.bf16.msrb.mxu3 %v2275_v59  ;;  %758 = vmatpush.bf16.msrb.mxu2 %v2278_v0  ;;  %v1846_v43 = vld [vmem:[#allocation3 + $0xe4] sm:$0xf]  ;;  %v1736_v44 = vld [vmem:[#allocation3 + $0xf0] sm:$0xf0]  ;;  %v1819_v45 = vld [vmem:[#allocation3 + $0xc] sm:$0xf]  ;;  %v2327_v49 = vor.u32 %v1829_v38, %v1662_v37  ;;  %v2331_v52 = vor.u32 %v1820_v42, %v1622_v41 }
  0x54   : > { %448 = vmatpush.bf16.msra.mxu0 %v1583_v17  ;;  %v1632_v47 = vld [vmem:[#allocation3 + $0x18] sm:$0xf0]  ;;  %v1646_v50 = vld [vmem:[#allocation3 + $0x28] sm:$0xf]  ;;  %v1825_v51 = vld [vmem:[#allocation3 + $0x34] sm:$0xf0]  ;;  %v2336_v53 = vor.u32 %v1846_v43, %v1736_v44 }
  0x55   : > { %v2338_v54 = vor.u32 %v1819_v45, %v1632_v47  ;;  %v1842_v56 = vld [vmem:[#allocation3 + $0xc4] sm:$0xf]  ;;  %v1720_v57 = vld [vmem:[#allocation3 + $0xd0] sm:$0xf0]  ;;  %v2341_v60 = vor.u32 %v1825_v51, %v1646_v50  ;;  %v1630_v61 = vld [vmem:[#allocation3 + $0x8] sm:$0xf] }
  0x56   : > { %734 = vmatpush.bf16.msrb.mxu1 %v2281_v5  ;;  %v1821_v62 = vld [vmem:[#allocation3 + $0x14] sm:$0xf0]  ;;  %v2347_v63 = vor.u32 %v1842_v56, %v1720_v57  ;;  %v1838_v1 = vld [vmem:[#allocation3 + $0xa4] sm:$0xf]  ;;  %v1704_v2 = vld [vmem:[#allocation3 + $0xb0] sm:$0xf0] }
  0x57   : > { %773 = vmatpush.bf16.msrb.mxu3 %v2286_v7  ;;  %759 = vmatpush.bf16.msrb.mxu2 %v2289_v12  ;;  %v2350_v3 = vor.u32 %v1821_v62, %v1630_v61  ;;  %v565_v4 = vld [vmem:[#allocation7] sm:$0xf]  ;;  %v2355_v6 = vor.u32 %v1838_v1, %v1704_v2  ;;  %v1834_v8 = vld [vmem:[#allocation3 + $0x84] sm:$0xf]  ;;  %v1688_v9 = vld [vmem:[#allocation3 + $0x90] sm:$0xf0] }
  0x58   : > { %856 = vmatpush.bf16.msrb.mxu0 %v2252_v33  ;;  %v2364_v10 = vor.u32 %v1834_v8, %v1688_v9  ;;  %v1830_v11 = vld [vmem:[#allocation3 + $0x64] sm:$0xf]  ;;  %v1672_v13 = vld [vmem:[#allocation3 + $0x70] sm:$0xf0]  ;;  %v374_v30 = vld [vmem:[%s2599_s4] sm:$0xf] }
  0x59   : > { %1612 = vmatmul.msk.bf16.vlgmr.msra.gmra.mxu0 %vm434_vm0, %v2257_v40  ;;  %1615 = vmatmul.msk.bf16.gmra.mxu1 %vm434_vm0, %v2298_v22  ;;  %v2324_v40 = vor.u32 %v1823_v32, %v1648_v34  ;;  %v2369_v14 = vor.u32 %v1830_v11, %v1672_v13  ;;  %v1826_v15 = vld [vmem:[#allocation3 + $0x44] sm:$0xf]  ;;  %v1656_v16 = vld [vmem:[#allocation3 + $0x50] sm:$0xf0]  ;;  %v377_v31 = vperm.slane %v374_v30, 1  ;;  %v379_v38 = vperm.slane %v374_v30, 3 }
  0x5a   : > { %735 = vmatpush.bf16.msrb.mxu1 %v2292_v18  ;;  %1619 = vmatmul.msk.bf16.gmra.mxu3 %vm434_vm0, %v2298_v22  ;;  %v2375_v17 = vor.u32 %v1826_v15, %v1656_v16  ;;  %v1822_v20 = vld [vmem:[#allocation3 + $0x24] sm:$0xf]  ;;  %v1640_v21 = vld [vmem:[#allocation3 + $0x30] sm:$0xf0]  ;;  %v378_v47 = vperm.slane %v374_v30, 2  ;;  %v2449_v2 = vperm.slane %v374_v30, 0 }
  0x5b   : > { %774 = vmatpush.bf16.msrb.mxu3 %v2295_v19  ;;  %760 = vmatpush.bf16.msrb.mxu2 %v2301_v25  ;;  %v1818_v23 = vld [vmem:[#allocation3 + $0x4] sm:$0xf]  ;;  %v1624_v24 = vld [vmem:[#allocation3 + $0x10] sm:$0xf0]  ;;  %s1454_s17 = sshll.u32 %s1450_s24, 4  ;;  %s2622_s20 = sand.u32 1, %s2071_s28   ;;  %s1455_s17 = int_to_ptr.hbm [resolvable:$true] %s1454_s17 }
  0x5c   : > { %857 = vmatpush.bf16.msrb.mxu0 %v2260_v46  ;;  %v2388_v26 = vor.u32 %v1818_v23, %v1624_v24  ;;  %s1442_s12 = scalar_lea.sflag [#allocation11], %s2622_s20  ;;  %s2025_s18 = sshra.s32 %s1455_s17, 4  ;;  %s2026_s18 = int_to_ptr.hbm [resolvable:$true] %s2025_s18 }
  0x5d   : > { %s2027_s21 = scalar_lea.hbm %s2026_s18, 1  ;;  %s2031_s1 = scalar_lea.hbm %s2603_s8, 3 }
  0x5e   : > { %736 = vmatpush.bf16.msrb.mxu1 %v2305_v28  ;;  %1617 = vmatmul.msk.bf16.gmra.mxu2 %vm434_vm0, %v2298_v22  ;;  %p2028_p12 = scmp.ne.s32.totalorder %s2026_s18, %s2027_s21  ;;  %p2032_p1 = scmp.lt.s32.totalorder %s2026_s18, %s2603_s8 }
  0x5f   : > { %775 = vmatpush.bf16.msrb.mxu3 %v2308_v29  ;;  %761 = vmatpush.bf16.msrb.mxu2 %v2315_v35  ;;  %p2033_p2 = scmp.lt.s32.totalorder %s2031_s1, %s2027_s21 }
  0x60   : > { %858 = vmatpush.bf16.msrb.mxu0 %v2272_v58  ;;  %p2029_p13 = pnand %p2028_p12, %p2168_p5 }
  0x61   : > { %p2034_p3 = por %p2033_p2, %p2032_p1 }
  0x62   : > { %737 = vmatpush.bf16.msrb.mxu1 %v2321_v39  ;;  %p2030_p0 = pneg %p2029_p13 }
  0x63   : > { %776 = vmatpush.bf16.msrb.mxu3 %v2324_v40  ;;  %762 = vmatpush.bf16.msrb.mxu2 %v2327_v49 }
  0x64   : > { %859 = vmatpush.bf16.msrb.mxu0 %v2281_v5  ;;  %p2035_p4 = pnand %p2034_p3, %p2030_p0 }
  0x66   : > { %738 = vmatpush.bf16.msrb.mxu1 %v2331_v52 }
  0x67   : > { %777 = vmatpush.bf16.msrb.mxu3 %v2338_v54  ;;  %763 = vmatpush.bf16.msrb.mxu2 %v2341_v60 }
  0x68   : > { %860 = vmatpush.bf16.msrb.mxu0 %v2292_v18 }
  0x69   : > { %1613 = vmatmul.msk.bf16.gmra.mxu0 %vm434_vm0, %v2298_v22  ;;  %739 = vmatmul.bf16.vlgmr.msrb.gmra.mxu1 %v565_v4  ;;  %v2382_v22 = vor.u32 %v1822_v20, %v1640_v21 }
  0x6a   : > { %744 = vmatpush.bf16.msra.mxu1 %v2336_v53  ;;  %778 = vmatmul.bf16.vlgmr.msrb.gmra.mxu3 %v565_v4 }
  0x6b   : > { %895 = vmatpush.bf16.msra.mxu3 %v2254_v36  ;;  %764 = vmatpush.bf16.msrb.mxu2 %v2350_v3 }
  0x6c   : > { %861 = vmatpush.bf16.msrb.mxu0 %v2305_v28 }
  0x6e   : > { %745 = vmatpush.bf16.msra.mxu1 %v2347_v63  ;;  %765 = vmatmul.bf16.vlgmr.msrb.gmra.mxu2 %v565_v4 }
  0x6f   : > { %882 = vmatpush.bf16.msra.mxu2 %v2267_v55  ;;  %896 = vmatpush.bf16.msra.mxu3 %v2263_v48 }
  0x70   : > { %862 = vmatpush.bf16.msrb.mxu0 %v2321_v39 }
  0x72   : > { %746 = vmatpush.bf16.msra.mxu1 %v2355_v6 }
  0x73   : > { %883 = vmatpush.bf16.msra.mxu2 %v2278_v0  ;;  %897 = vmatpush.bf16.msra.mxu3 %v2275_v59 }
  0x74   : > { %863 = vmatpush.bf16.msrb.mxu0 %v2331_v52 }
  0x76   : > { %747 = vmatpush.bf16.msra.mxu1 %v2364_v10 }
  0x77   : > { %884 = vmatpush.bf16.msra.mxu2 %v2289_v12  ;;  %898 = vmatpush.bf16.msra.mxu3 %v2286_v7 }
  0x78   : > { %981 = vmatpush.bf16.msra.mxu0 %v2252_v33 }
  0x7a   : > { %748 = vmatpush.bf16.msra.mxu1 %v2369_v14 }
  0x7b   : > { %885 = vmatpush.bf16.msra.mxu2 %v2301_v25  ;;  %899 = vmatpush.bf16.msra.mxu3 %v2295_v19 }
  0x7c   : > { %982 = vmatpush.bf16.msra.mxu0 %v2260_v46 }
  0x7e   : > { %749 = vmatpush.bf16.msra.mxu1 %v2375_v17 }
  0x7f   : > { %886 = vmatpush.bf16.msra.mxu2 %v2315_v35  ;;  %900 = vmatpush.bf16.msra.mxu3 %v2308_v29 }
  0x80   : > { %983 = vmatpush.bf16.msra.mxu0 %v2272_v58 }
  0x82   : > { %750 = vmatpush.bf16.msra.mxu1 %v2382_v22 }
  0x83   : > { %887 = vmatpush.bf16.msra.mxu2 %v2327_v49  ;;  %901 = vmatpush.bf16.msra.mxu3 %v2324_v40 }
  0x84   : > { %984 = vmatpush.bf16.msra.mxu0 %v2281_v5 }
  0x86   : > { %751 = vmatpush.bf16.msra.mxu1 %v2388_v26 }
  0x87   : > { %888 = vmatpush.bf16.msra.mxu2 %v2341_v60  ;;  %902 = vmatpush.bf16.msra.mxu3 %v2338_v54 }
  0x88   : > { %985 = vmatpush.bf16.msra.mxu0 %v2292_v18 }
  0x89   : > { %752 = vmatmul.bf16.vlgmr.msra.gmra.mxu1 %v565_v4 }
  0x8a   : > { %869 = vmatpush.bf16.msrb.mxu1 %v2336_v53 }
  0x8b   : > { %1020 = vmatpush.bf16.msrb.mxu3 %v2254_v36  ;;  %889 = vmatpush.bf16.msra.mxu2 %v2350_v3 }
  0x8c   : > { %986 = vmatpush.bf16.msra.mxu0 %v2305_v28 }
  0x8e   : > { %870 = vmatpush.bf16.msrb.mxu1 %v2347_v63 }
  0x8f   : > { %1007 = vmatpush.bf16.msrb.mxu2 %v2267_v55  ;;  %1021 = vmatpush.bf16.msrb.mxu3 %v2263_v48 }
  0x90   : > { %987 = vmatpush.bf16.msra.mxu0 %v2321_v39 }
  0x92   : > { %871 = vmatpush.bf16.msrb.mxu1 %v2355_v6 }
  0x93   : > { %1008 = vmatpush.bf16.msrb.mxu2 %v2278_v0  ;;  %1022 = vmatpush.bf16.msrb.mxu3 %v2275_v59 }
  0x94   : > { %988 = vmatpush.bf16.msra.mxu0 %v2331_v52 }
  0x96   : > { %872 = vmatpush.bf16.msrb.mxu1 %v2364_v10 }
  0x97   : > { %1009 = vmatpush.bf16.msrb.mxu2 %v2289_v12  ;;  %1023 = vmatpush.bf16.msrb.mxu3 %v2286_v7 }
  0x9a   : > { %873 = vmatpush.bf16.msrb.mxu1 %v2369_v14 }
  0x9b   : > { %1010 = vmatpush.bf16.msrb.mxu2 %v2301_v25  ;;  %1024 = vmatpush.bf16.msrb.mxu3 %v2295_v19 }
  0x9e   : > { %874 = vmatpush.bf16.msrb.mxu1 %v2375_v17 }
  0x9f   : > { %1011 = vmatpush.bf16.msrb.mxu2 %v2315_v35  ;;  %1025 = vmatpush.bf16.msrb.mxu3 %v2308_v29 }
  0xa2   : > { %875 = vmatpush.bf16.msrb.mxu1 %v2382_v22 }
  0xa3   : > { %1012 = vmatpush.bf16.msrb.mxu2 %v2327_v49  ;;  %1026 = vmatpush.bf16.msrb.mxu3 %v2324_v40 }
  0xa6   : > { %876 = vmatpush.bf16.msrb.mxu1 %v2388_v26 }
  0xa7   : > { %1013 = vmatpush.bf16.msrb.mxu2 %v2341_v60  ;;  %1027 = vmatpush.bf16.msrb.mxu3 %v2338_v54 }
  0xaa   : > { %994 = vmatpush.bf16.msra.mxu1 %v2336_v53 }
  0xab   : > { %1014 = vmatpush.bf16.msrb.mxu2 %v2350_v3 }
  0xae   : > { %995 = vmatpush.bf16.msra.mxu1 %v2347_v63 }
  0xb2   : > { %996 = vmatpush.bf16.msra.mxu1 %v2355_v6 }
  0xb6   : > { %997 = vmatpush.bf16.msra.mxu1 %v2364_v10 }
  0xba   : > { %998 = vmatpush.bf16.msra.mxu1 %v2369_v14 }
  0xbe   : > { %999 = vmatpush.bf16.msra.mxu1 %v2375_v17 }
  0xc2   : > { %1000 = vmatpush.bf16.msra.mxu1 %v2382_v22 }
  0xc6   : > { %1001 = vmatpush.bf16.msra.mxu1 %v2388_v26  ;;  %v469_v27 = vpop.f32.mrf.mxu1 }
  0xcd   : > { %v507_v32 = vpop.f32.mrf.mxu3 }
  0xce   : > { %v471_v34 = vpop.f32.mrf.mxu1 }
  0xcf   : > { %v2437_v37 = vadd.f32 %v471_v34, %v377_v31 }
  0xd1   : > { %v488_v41 = vpop.f32.mrf.mxu2 }
  0xd5   : > { %v509_v42 = vpop.f32.mrf.mxu3 }
  0xd6   : > { %v2439_v43 = vadd.f32 %v509_v42, %v379_v38  ;;  %v474_v44 = vpop.f32.mrf.mxu1  ;;  %v450_v8 = vpop.f32.mrf.mxu0 }
  0xd7   : > { %v2441_v45 = vadd.f32 %v474_v44, %v377_v31  ;;  %v451_v15 = vadd.f32 %v450_v8, %v2449_v2  ;;  %v508_v44 = vadd.f32 %v507_v32, %v379_v38 }
  0xd9   : > { %v490_v50 = vpop.f32.mrf.mxu2 }
  0xda   : > { %v2443_v51 = vadd.f32 %v490_v50, %v378_v47 }
  0xdd   : > { %v512_v56 = vpop.f32.mrf.mxu3 }
  0xde   : > { %v2445_v57 = vadd.f32 %v512_v56, %v379_v38  ;;  %v476_v61 = vpop.f32.mrf.mxu1 }
  0xdf   : > { %v2447_v62 = vadd.f32 %v476_v61, %v377_v31 }
  0xe1   : > { %2614 = vst [vmem:[#allocation23_spill] sm:$0xff] %v2447_v62  ;;  %v493_v1 = vpop.f32.mrf.mxu2 }
  0xe2   : > { %v2451_v4 = vadd.f32 %v493_v1, %v378_v47 }
  0xe4   : > { %2615 = vst [vmem:[#allocation24_spill] sm:$0xff] %v2451_v4 }
  0xe5   : > { %v514_v9 = vpop.f32.mrf.mxu3 }
  0xe6   : > { %v2453_v11 = vadd.f32 %v514_v9, %v379_v38  ;;  %v740_v13 = vpop.f32.mrf.mxu1 }
  0xe7   : > { %v783_v20 = vadd.f32 %v740_v13, %v451_v15 }
  0xe8   : > { %2616 = vst [vmem:[#allocation25_spill] sm:$0xff] %v2453_v11  ;;  %v470_v11 = vadd.f32 %v469_v27, %v377_v31 }
  0xe9   : > { %v495_v16 = vpop.f32.mrf.mxu2  ;;  %v1748_v34 = vmul.f32 -1.442695, %v783_v20 }
  0xea   : > { %v2456_v21 = vadd.f32 %v495_v16, %v378_v47 }
  0xeb   : > { %1907 = vpow2.f32 %v1748_v34 }
  0xec   : > { %2617 = vst [vmem:[#allocation26_spill] sm:$0xff] %v2456_v21 }
  0xed   : > { %v779_v23 = vpop.f32.mrf.mxu3 }
  0xee   : > { %v742_v24 = vpop.f32.mrf.mxu1  ;;  %v786_v50 = vadd.f32 %v779_v23, %v508_v44  ;;  %v489_v23 = vadd.f32 %v488_v41, %v378_v47 }
  0xf0   : > { %v1750_v1 = vmul.f32 -1.442695, %v786_v50 }
  0xf1   : > { %v766_v42 = vpop.f32.mrf.mxu2  ;;  %v1908_v56 = vpop.eup %1907 }
  0xf2   : > { %v790_v9 = vadd.f32 1.0, %v1908_v56  ;;  %1909 = vpow2.f32 %v1750_v1  ;;  %v785_v31 = vadd.f32 %v766_v42, %v489_v23 }
  0xf4   : > { %1911 = vrcp.f32 %v790_v9  ;;  %vm796_vm1 = vweird.f32 %v790_v9  ;;  %v802_v56 = vand.u32 2147483648, %v790_v9 }
  0xf5   : > { %v781_v30 = vpop.f32.mrf.mxu3 }
  0xf6   : > { %v803_v47 = vor.u32 1.1754944e-38, %v802_v56 }
  0xf8   : > { %v1910_v15 = vpop.eup %1909 }
  0xf9   : > { %v768_v61 = vpop.f32.mrf.mxu2  ;;  %v829_v21 = vadd.f32 1.0, %v1910_v15 }
  0xfa   : > { %v1912_v16 = vpop.eup %1911  ;;  %v800_v61 = vand.u32 2147483647, %v790_v9 }
  0xfb   : > { %v792_v20 = vmul.f32 %v1912_v16, %v790_v9  ;;  %vm797_vm2 = vweird.f32 %v1912_v16  ;;  %vm835_vm10 = vweird.f32 %v829_v21 }
  0xfc   : > { %vm798_vm3 = vmor %vm796_vm1, %vm797_vm2  ;;  %vm801_vm5 = vcmp.eq.f32.partialorder %v800_v61, 8.507059e+37 }
  0xfd   : > { %v793_v34 = vsub.f32 1.0, %v792_v20 }
  0xff   : > { %v794_v44 = vmul.f32 %v1912_v16, %v793_v34 }
 0x101   : > { %v795_v50 = vadd.f32 %v1912_v16, %v794_v44 }
 0x106   : > { %v753_v8 = vpop.f32.mrf.mxu1 }
 0x107   : > { %v784_v62 = vadd.f32 %v753_v8, %v470_v11 }
 0x109   : > { %v1749_v13 = vmul.f32 -1.442695, %v784_v62 }
 0x10b   : > { %1913 = vpow2.f32 %v1749_v13  ;;  %v799_v13 = vsel %vm798_vm3, %v1912_v16, %v795_v50 }
 0x10c   : > { %1915 = vrcp.f32 %v829_v21  ;;  %v804_v42 = vsel %vm801_vm5, %v803_v47, %v799_v13 }
 0x10e   : > { %v755_v24 = vpop.f32.mrf.mxu1 }
 0x111   : > { %v1914_v32 = vpop.eup %1913 }
 0x112   : > { %v809_v38 = vadd.f32 1.0, %v1914_v32  ;;  %v1916_v30 = vpop.eup %1915  ;;  %v566_v32 = vld [vmem:[#allocation8] sm:$0xff] }
 0x113   : > { %v831_v11 = vmul.f32 %v1916_v30, %v829_v21  ;;  %vm836_vm9 = vweird.f32 %v1916_v30 }
 0x114   : > { %1917 = vrcp.f32 %v809_v38  ;;  %v821_v8 = vand.u32 2147483648, %v809_v38  ;;  %v819_v24 = vand.u32 2147483647, %v809_v38  ;;  %vm815_vm6 = vweird.f32 %v809_v38  ;;  %vm837_vm11 = vmor %vm835_vm10, %vm836_vm9 }
 0x115   : > { %1919 = vtanh.f32 %v785_v31  ;;  %v832_v41 = vsub.f32 1.0, %v831_v11  ;;  %v841_v11 = vand.u32 2147483648, %v829_v21 }
 0x116   : > { %v822_v34 = vor.u32 1.1754944e-38, %v821_v8  ;;  %vm820_vm8 = vcmp.eq.f32.partialorder %v819_v24, 8.507059e+37 }
 0x117   : > { %v833_v44 = vmul.f32 %v1916_v30, %v832_v41  ;;  %v842_v61 = vor.u32 1.1754944e-38, %v841_v11 }
 0x119   : > { %v834_v50 = vadd.f32 %v1916_v30, %v833_v44 }
 0x11a   : > { %v1918_v27 = vpop.eup %1917 }
 0x11b   : > { %v811_v62 = vmul.f32 %v1918_v27, %v809_v38  ;;  %vm816_vm4 = vweird.f32 %v1918_v27  ;;  %v1920_v9 = vpop.eup %1919  ;;  %v839_v38 = vand.u32 2147483647, %v829_v21  ;;  %v838_v56 = vsel %vm837_vm11, %v1916_v30, %v834_v50 }
 0x11c   : > { %vm817_vm7 = vmor %vm815_vm6, %vm816_vm4  ;;  %v846_v31 = vmul.f32 %v1920_v9, %v804_v42 }
 0x11d   : > { %v812_v1 = vsub.f32 1.0, %v811_v62  ;;  %vm840_vm12 = vcmp.eq.f32.partialorder %v839_v38, 8.507059e+37 }
 0x11f   : > { %v813_v15 = vmul.f32 %v1918_v27, %v812_v1  ;;  %v843_v1 = vsel %vm840_vm12, %v842_v61, %v838_v56 }
 0x121   : > { %v814_v20 = vadd.f32 %v1918_v27, %v813_v15 }
 0x123   : > { %v818_v23 = vsel %vm817_vm7, %v1918_v27, %v814_v20 }
 0x124   : > { %v823_v62 = vsel %vm820_vm8, %v822_v34, %v818_v23 }
 0x125   : > { %v845_v4 = vmul.f32 %v823_v62, %v566_v32 }
 0x127   : > { %v2458_v16 = vadd.f32 %v846_v31, %v845_v4 }
 0x129   : > { %1921 = vtanh.f32 %v2458_v16 }
 0x12f   : > { %v1922_v27 = vpop.eup %1921 }
 0x130   : > { %v849_v8 = vmul.f32 %v1922_v27, %v843_v1 }
 0x132   : > { %v850_v13 = vpack.c.bf16 %v849_v8, %v849_v8 }
 0x134   : > { %851 = vst [vmem:[#allocation6] sm:$0xf] %v850_v13  ;;  %864 = vmatmul.bf16.vlgmr.msrb.gmra.mxu0 %v850_v13  ;;  %877 = vmatmul.bf16.vlgmr.msrb.gmra.mxu1 %v850_v13 }
 0x135   : > { %890 = vmatmul.bf16.vlgmr.msra.gmra.mxu2 %v850_v13  ;;  %903 = vmatmul.bf16.vlgmr.msra.gmra.mxu3 %v850_v13 }
 0x136   : > { %1106 = vmatpush.bf16.msrb.mxu0 %v2252_v33  ;;  %1119 = vmatpush.bf16.msrb.mxu1 %v2336_v53  ;;  %v452_v33 = vpop.f32.mrf.mxu0 }
 0x137   : > { %1132 = vmatpush.bf16.msra.mxu2 %v2267_v55  ;;  %1145 = vmatpush.bf16.msra.mxu3 %v2254_v36 }
 0x13a   : > { %1107 = vmatpush.bf16.msrb.mxu0 %v2260_v46  ;;  %1120 = vmatpush.bf16.msrb.mxu1 %v2347_v63 }
 0x13b   : > { %1133 = vmatpush.bf16.msra.mxu2 %v2278_v0  ;;  %1146 = vmatpush.bf16.msra.mxu3 %v2263_v48  ;;  %v453_v48 = vadd.f32 %v452_v33, %v2449_v2 }
 0x13e   : > { %1108 = vmatpush.bf16.msrb.mxu0 %v2272_v58  ;;  %1121 = vmatpush.bf16.msrb.mxu1 %v2355_v6  ;;  %v2493_v36 = vpop.f32.mrf.mxu0 }
 0x13f   : > { %1134 = vmatpush.bf16.msra.mxu2 %v2289_v12  ;;  %1147 = vmatpush.bf16.msra.mxu3 %v2275_v59 }
 0x142   : > { %1109 = vmatpush.bf16.msrb.mxu0 %v2281_v5  ;;  %1122 = vmatpush.bf16.msrb.mxu1 %v2364_v10 }
 0x143   : > { %1135 = vmatpush.bf16.msra.mxu2 %v2301_v25  ;;  %1148 = vmatpush.bf16.msra.mxu3 %v2286_v7 }
 0x146   : > { %1110 = vmatpush.bf16.msrb.mxu0 %v2292_v18  ;;  %1123 = vmatpush.bf16.msrb.mxu1 %v2369_v14  ;;  %v2495_v46 = vpop.f32.mrf.mxu0 }
 0x147   : > { %1136 = vmatpush.bf16.msra.mxu2 %v2315_v35  ;;  %1149 = vmatpush.bf16.msra.mxu3 %v2295_v19 }
 0x14a   : > { %1111 = vmatpush.bf16.msrb.mxu0 %v2305_v28  ;;  %1124 = vmatpush.bf16.msrb.mxu1 %v2375_v17 }
 0x14b   : > { %1137 = vmatpush.bf16.msra.mxu2 %v2327_v49  ;;  %1150 = vmatpush.bf16.msra.mxu3 %v2308_v29 }
 0x14e   : > { %1112 = vmatpush.bf16.msrb.mxu0 %v2321_v39  ;;  %1125 = vmatpush.bf16.msrb.mxu1 %v2382_v22 }
 0x14f   : > { %1138 = vmatpush.bf16.msra.mxu2 %v2341_v60  ;;  %1151 = vmatpush.bf16.msra.mxu3 %v2324_v40 }
 0x152   : > { %1113 = vmatpush.bf16.msrb.mxu0 %v2331_v52  ;;  %1126 = vmatpush.bf16.msrb.mxu1 %v2388_v26 }
 0x153   : > { %1139 = vmatpush.bf16.msra.mxu2 %v2350_v3  ;;  %1152 = vmatpush.bf16.msra.mxu3 %v2338_v54 }
 0x1b1   : > { %v865_v55 = vpop.f32.mrf.mxu0  ;;  %v878_v58 = vpop.f32.mrf.mxu1 }
 0x1b2   : > { %v908_v59 = vadd.f32 %v865_v55, %v453_v48  ;;  %v909_v0 = vadd.f32 %v878_v58, %v2437_v37  ;;  %v1859_v55 = vld [vmem:[#allocation4 + $0x38] sm:$0xff] }
 0x1b4   : > { %v1751_v5 = vmul.f32 -1.442695, %v908_v59  ;;  %v1752_v7 = vmul.f32 -1.442695, %v909_v0 }
 0x1b6   : > { %1923 = vpow2.f32 %v1751_v5 }
 0x1b7   : > { %1925 = vpow2.f32 %v1752_v7 }
 0x1b8   : > { %v891_v12 = vpop.f32.mrf.mxu2  ;;  %v904_v18 = vpop.f32.mrf.mxu3 }
 0x1b9   : > { %v911_v19 = vadd.f32 %v904_v18, %v2439_v43  ;;  %v867_v25 = vpop.f32.mrf.mxu0  ;;  %v880_v28 = vpop.f32.mrf.mxu1  ;;  %v910_v3 = vadd.f32 %v891_v12, %v2443_v51  ;;  %v1858_v18 = vld [vmem:[#allocation4 + $0x28] sm:$0xff] }
 0x1bb   : > { %v1753_v29 = vmul.f32 -1.442695, %v911_v19  ;;  %v1857_v19 = vld [vmem:[#allocation4 + $0x20] sm:$0xff] }
 0x1bc   : > { %v1924_v35 = vpop.eup %1923 }
 0x1bd   : > { %v1926_v39 = vpop.eup %1925  ;;  %v915_v40 = vadd.f32 1.0, %v1924_v35  ;;  %1927 = vpow2.f32 %v1753_v29 }
 0x1be   : > { %v934_v49 = vadd.f32 1.0, %v1926_v39  ;;  %v1856_v39 = vld [vmem:[#allocation4 + $0x8] sm:$0xff] }
 0x1bf   : > { %1929 = vrcp.f32 %v915_v40  ;;  %v927_v26 = vand.u32 2147483648, %v915_v40  ;;  %v925_v4 = vand.u32 2147483647, %v915_v40  ;;  %vm921_vm15 = vweird.f32 %v915_v40 }
 0x1c0   : > { %1931 = vrcp.f32 %v934_v49  ;;  %v893_v52 = vpop.f32.mrf.mxu2  ;;  %v906_v53 = vpop.f32.mrf.mxu3  ;;  %v946_v37 = vand.u32 2147483648, %v934_v49  ;;  %v944_v30 = vand.u32 2147483647, %v934_v49  ;;  %vm940_vm0 = vweird.f32 %v934_v49 }
 0x1c1   : > { %v928_v51 = vor.u32 1.1754944e-38, %v927_v26  ;;  %vm926_vm3 = vcmp.eq.f32.partialorder %v925_v4, 8.507059e+37 }
 0x1c2   : > { %v947_v20 = vor.u32 1.1754944e-38, %v946_v37  ;;  %vm945_vm4 = vcmp.eq.f32.partialorder %v944_v30, 8.507059e+37  ;;  %v1853_v37 = vld [vmem:[#allocation4] sm:$0xff] }
 0x1c3   : > { %v1928_v54 = vpop.eup %1927 }
 0x1c4   : > { %v954_v60 = vadd.f32 1.0, %v1928_v54 }
 0x1c5   : > { %v1930_v63 = vpop.eup %1929 }
 0x1c6   : > { %v1932_v6 = vpop.eup %1931  ;;  %v917_v10 = vmul.f32 %v1930_v63, %v915_v40  ;;  %1933 = vrcp.f32 %v954_v60  ;;  %vm922_vm13 = vweird.f32 %v1930_v63  ;;  %v966_v56 = vand.u32 2147483648, %v954_v60 }
 0x1c7   : > { %v936_v14 = vmul.f32 %v1932_v6, %v934_v49  ;;  %1935 = vtanh.f32 %v910_v3  ;;  %vm941_vm14 = vweird.f32 %v1932_v6  ;;  %vm923_vm1 = vmor %vm921_vm15, %vm922_vm13  ;;  %vm960_vm6 = vweird.f32 %v954_v60  ;;  %v1854_v3 = vld [vmem:[#allocation4 + $0x18] sm:$0xff] }
 0x1c8   : > { %v918_v17 = vsub.f32 1.0, %v917_v10  ;;  %vm942_vm2 = vmor %vm940_vm0, %vm941_vm14  ;;  %v964_v61 = vand.u32 2147483647, %v954_v60  ;;  %v967_v1 = vor.u32 1.1754944e-38, %v966_v56 }
 0x1c9   : > { %v937_v22 = vsub.f32 1.0, %v936_v14  ;;  %v2618_v14 = vld [vmem:[#allocation24_spill] sm:$0xff] }
 0x1ca   : > { %v919_v43 = vmul.f32 %v1930_v63, %v918_v17  ;;  %vm965_vm8 = vcmp.eq.f32.partialorder %v964_v61, 8.507059e+37 }
 0x1cb   : > { %v938_v21 = vmul.f32 %v1932_v6, %v937_v22 }
 0x1cc   : > { %v1934_v15 = vpop.eup %1933  ;;  %v920_v24 = vadd.f32 %v1930_v63, %v919_v43 }
 0x1cd   : > { %v939_v41 = vadd.f32 %v1932_v6, %v938_v21  ;;  %v956_v47 = vmul.f32 %v1934_v15, %v954_v60  ;;  %v1936_v32 = vpop.eup %1935  ;;  %vm961_vm5 = vweird.f32 %v1934_v15 }
 0x1ce   : > { %v924_v42 = vsel %vm923_vm1, %v1930_v63, %v920_v24  ;;  %vm962_vm7 = vmor %vm960_vm6, %vm961_vm5  ;;  %v1855_v63 = vld [vmem:[#allocation4 + $0x10] sm:$0xff] }
 0x1cf   : > { %v929_v34 = vsel %vm926_vm3, %v928_v51, %v924_v42  ;;  %v943_v23 = vsel %vm942_vm2, %v1932_v6, %v939_v41  ;;  %v957_v9 = vsub.f32 1.0, %v956_v47  ;;  %v1852_v41 = vld [vmem:[#allocation4 + $0x30] sm:$0xff] }
 0x1d0   : > { %v948_v44 = vsel %vm945_vm4, %v947_v20, %v943_v23  ;;  %v971_v62 = vmul.f32 %v1936_v32, %v929_v34 }
 0x1d1   : > { %v970_v31 = vmul.f32 %v948_v44, %v2458_v16  ;;  %v958_v50 = vmul.f32 %v1934_v15, %v957_v9  ;;  %v456_v16 = vadd.f32 %v2493_v36, %v2449_v2 }
 0x1d3   : > { %v2502_v11 = vadd.f32 %v971_v62, %v970_v31  ;;  %v959_v38 = vadd.f32 %v1934_v15, %v958_v50 }
 0x1d5   : > { %1937 = vtanh.f32 %v2502_v11  ;;  %v963_v27 = vsel %vm962_vm7, %v1934_v15, %v959_v38 }
 0x1d6   : > { %v968_v13 = vsel %vm965_vm8, %v967_v1, %v963_v27  ;;  %v1372_v1 = vld [vmem:[%s2189_s26] sm:$0xff] }
 0x1db   : > { %v1938_v8 = vpop.eup %1937 }
 0x1dc   : > { %v974_v33 = vmul.f32 %v1938_v8, %v968_v13 }
 0x1de   : > { %v975_v48 = vpack.c.bf16 %v974_v33, %v974_v33  ;;  %v2084_v33 = vmov 0  }
 0x1df   : > { %1903 = vset.pattern.permute.xlu2 %v2084_v33  ;;  %1904 = vset.pattern.permute.xlu0 %v2084_v33 }
 0x1e0   : > { %976 = vst [vmem:[#allocation6 + $0x4] sm:$0xf] %v975_v48  ;;  %989 = vmatmul.bf16.vlgmr.msra.gmra.mxu0 %v975_v48  ;;  %1002 = vmatmul.bf16.vlgmr.msra.gmra.mxu1 %v975_v48 }
 0x1e1   : > { %1015 = vmatmul.bf16.vlgmr.msrb.gmra.mxu2 %v975_v48  ;;  %1028 = vmatmul.bf16.vlgmr.msrb.gmra.mxu3 %v975_v48 }
 0x1e2   : > { %1313 = vmatpush.bf16.msra.mxu0 %v1859_v55  ;;  %1379 = vperm.xlu2 %1903, %v1372_v1  }
 0x1e3   : > { %1905 = vset.pattern.permute.xlu1 %v2084_v33 }
 0x1e6   : > { %1314 = vmatpush.bf16.msra.mxu0 %v1858_v18 }
 0x1ea   : > { %1315 = vmatpush.bf16.msra.mxu0 %v1857_v19  ;;  %v1850_v19 = vld [vmem:[#allocation6] sm:$0xff] }
 0x1ee   : > { %1316 = vmatpush.bf16.msra.mxu0 %v1856_v39 }
 0x1f2   : > { %1317 = vmatpush.bf16.msra.mxu0 %v1855_v63 }
 0x1f6   : > { %1318 = vmatpush.bf16.msra.mxu0 %v1854_v3 }
 0x1fa   : > { %1319 = vmatpush.bf16.msra.mxu0 %v1853_v37 }
 0x1fe   : > { %1320 = vmatpush.bf16.msra.mxu0 %v1852_v41 }
 0x25d   : > { %v990_v58 = vpop.f32.mrf.mxu0  ;;  %v1003_v59 = vpop.f32.mrf.mxu1 }
 0x25e   : > { %v1033_v0 = vadd.f32 %v990_v58, %v456_v16  ;;  %v1034_v5 = vadd.f32 %v1003_v59, %v2441_v45  ;;  %v1373_v59 = vld [vmem:[%s2189_s26 + $0x8] sm:$0xff] }
 0x25f   : > { %1382 = vperm.xlu2 %1903, %v1373_v59  }
 0x260   : > { %v1754_v7 = vmul.f32 -1.442695, %v1033_v0  ;;  %v1755_v12 = vmul.f32 -1.442695, %v1034_v5 }
 0x262   : > { %1939 = vpow2.f32 %v1754_v7 }
 0x263   : > { %1941 = vpow2.f32 %v1755_v12 }
 0x264   : > { %v1016_v25 = vpop.f32.mrf.mxu2  ;;  %v1029_v28 = vpop.f32.mrf.mxu3 }
 0x265   : > { %v1036_v29 = vadd.f32 %v1029_v28, %v2445_v57  ;;  %v992_v35 = vpop.f32.mrf.mxu0  ;;  %v1005_v36 = vpop.f32.mrf.mxu1  ;;  %v1035_v17 = vadd.f32 %v1016_v25, %v2618_v14  ;;  %v458_v25 = vadd.f32 %v2495_v46, %v2449_v2  ;;  %v2523_v46 = vld [vmem:[%s2600_s5] ss:$0 sm:$0xff] }
 0x266   : > { %v2619_v36 = vld [vmem:[#allocation23_spill] sm:$0xff] }
 0x267   : > { %v1756_v40 = vmul.f32 -1.442695, %v1036_v29 }
 0x268   : > { %v1940_v49 = vpop.eup %1939 }
 0x269   : > { %v1942_v52 = vpop.eup %1941  ;;  %v1040_v45 = vadd.f32 1.0, %v1940_v49  ;;  %1943 = vpow2.f32 %v1756_v40 }
 0x26a   : > { %v1059_v53 = vadd.f32 1.0, %v1942_v52 }
 0x26b   : > { %1945 = vrcp.f32 %v1040_v45  ;;  %v1052_v30 = vand.u32 2147483648, %v1040_v45  ;;  %v1050_v51 = vand.u32 2147483647, %v1040_v45  ;;  %vm1046_vm11 = vweird.f32 %v1040_v45 }
 0x26c   : > { %1947 = vrcp.f32 %v1059_v53  ;;  %v1018_v54 = vpop.f32.mrf.mxu2  ;;  %v1031_v60 = vpop.f32.mrf.mxu3  ;;  %v1071_v15 = vand.u32 2147483648, %v1059_v53  ;;  %v1069_v20 = vand.u32 2147483647, %v1059_v53  ;;  %vm1065_vm12 = vweird.f32 %v1059_v53 }
 0x26d   : > { %v1053_v34 = vor.u32 1.1754944e-38, %v1052_v30  ;;  %vm1051_vm15 = vcmp.eq.f32.partialorder %v1050_v51, 8.507059e+37 }
 0x26e   : > { %v1072_v44 = vor.u32 1.1754944e-38, %v1071_v15  ;;  %vm1070_vm0 = vcmp.eq.f32.partialorder %v1069_v20, 8.507059e+37 }
 0x26f   : > { %v1944_v6 = vpop.eup %1943 }
 0x270   : > { %v1079_v57 = vadd.f32 1.0, %v1944_v6 }
 0x271   : > { %v1946_v10 = vpop.eup %1945 }
 0x272   : > { %v1948_v22 = vpop.eup %1947  ;;  %v1042_v26 = vmul.f32 %v1946_v10, %v1040_v45  ;;  %1949 = vrcp.f32 %v1079_v57  ;;  %vm1047_vm9 = vweird.f32 %v1946_v10  ;;  %v1091_v55 = vand.u32 2147483648, %v1079_v57 }
 0x273   : > { %v1061_v43 = vmul.f32 %v1948_v22, %v1059_v53  ;;  %1951 = vtanh.f32 %v1035_v17  ;;  %vm1066_vm10 = vweird.f32 %v1948_v22  ;;  %vm1048_vm13 = vmor %vm1046_vm11, %vm1047_vm9  ;;  %vm1085_vm2 = vweird.f32 %v1079_v57  ;;  %v2620_v53 = vld [vmem:[#allocation25_spill] sm:$0xff] }
 0x274   : > { %v1043_v4 = vsub.f32 1.0, %v1042_v26  ;;  %vm1067_vm14 = vmor %vm1065_vm12, %vm1066_vm10  ;;  %v1089_v58 = vand.u32 2147483647, %v1079_v57  ;;  %v1092_v5 = vor.u32 1.1754944e-38, %v1091_v55 }
 0x275   : > { %v1062_v21 = vsub.f32 1.0, %v1061_v43 }
 0x276   : > { %v1044_v24 = vmul.f32 %v1946_v10, %v1043_v4  ;;  %vm1090_vm4 = vcmp.eq.f32.partialorder %v1089_v58, 8.507059e+37 }
 0x277   : > { %v1063_v47 = vmul.f32 %v1948_v22, %v1062_v21  ;;  %v2621_v21 = vld [vmem:[#allocation26_spill] sm:$0xff] }
 0x278   : > { %v1950_v42 = vpop.eup %1949  ;;  %v1045_v32 = vadd.f32 %v1946_v10, %v1044_v24 }
 0x279   : > { %v1064_v23 = vadd.f32 %v1948_v22, %v1063_v47  ;;  %v1081_v9 = vmul.f32 %v1950_v42, %v1079_v57  ;;  %v1952_v31 = vpop.eup %1951  ;;  %vm1086_vm1 = vweird.f32 %v1950_v42 }
 0x27a   : > { %v1049_v62 = vsel %vm1048_vm13, %v1946_v10, %v1045_v32  ;;  %vm1087_vm3 = vmor %vm1085_vm2, %vm1086_vm1 }
 0x27b   : > { %v1054_v50 = vsel %vm1051_vm15, %v1053_v34, %v1049_v62  ;;  %v1068_v38 = vsel %vm1067_vm14, %v1948_v22, %v1064_v23  ;;  %v1082_v56 = vsub.f32 1.0, %v1081_v9 }
 0x27c   : > { %v1073_v61 = vsel %vm1070_vm0, %v1072_v44, %v1068_v38  ;;  %v1096_v27 = vmul.f32 %v1952_v31, %v1054_v50 }
 0x27d   : > { %v1095_v8 = vmul.f32 %v1073_v61, %v2502_v11  ;;  %v1083_v13 = vmul.f32 %v1950_v42, %v1082_v56 }
 0x27f   : > { %v2512_v48 = vadd.f32 %v1096_v27, %v1095_v8  ;;  %v1084_v16 = vadd.f32 %v1950_v42, %v1083_v13 }
 0x281   : > { %1953 = vtanh.f32 %v2512_v48  ;;  %v1088_v0 = vsel %vm1087_vm3, %v1950_v42, %v1084_v16 }
 0x282   : > { %v1093_v7 = vsel %vm1090_vm4, %v1092_v5, %v1088_v0 }
 0x287   : > { %v1954_v11 = vpop.eup %1953 }
 0x288   : > { %v1099_v12 = vmul.f32 %v1954_v11, %v1093_v7 }
 0x28a   : > { %v1100_v18 = vpack.c.bf16 %v1099_v12, %v1099_v12 }
 0x28c   : > { %1101 = vst [vmem:[#allocation6 + $0x8] sm:$0xf] %v1100_v18  ;;  %1114 = vmatmul.bf16.vlgmr.msrb.gmra.mxu0 %v1100_v18  ;;  %1127 = vmatmul.bf16.vlgmr.msrb.gmra.mxu1 %v1100_v18 }
 0x28d   : > { %1140 = vmatmul.bf16.vlgmr.msra.gmra.mxu2 %v1100_v18  ;;  %1153 = vmatmul.bf16.vlgmr.msra.gmra.mxu3 %v1100_v18 }
 0x29c   : > { %1321 = vmatmul.bf16.vlgmr.msra.gmra.mxu0 %v1850_v19 }
 0x309   : > { %v1115_v28 = vpop.f32.mrf.mxu0  ;;  %v1128_v29 = vpop.f32.mrf.mxu1 }
 0x30a   : > { %v1158_v35 = vadd.f32 %v1115_v28, %v458_v25  ;;  %v1159_v39 = vadd.f32 %v1128_v29, %v2619_v36 }
 0x30c   : > { %v1757_v40 = vmul.f32 -1.442695, %v1158_v35  ;;  %v1758_v49 = vmul.f32 -1.442695, %v1159_v39  ;;  %v1374_v35 = vld [vmem:[%s2189_s26 + $0x10] sm:$0xff] }
 0x30e   : > { %1955 = vpow2.f32 %v1757_v40 }
 0x30f   : > { %1957 = vpow2.f32 %v1758_v49 }
 0x310   : > { %v1141_v52 = vpop.f32.mrf.mxu2  ;;  %v1154_v45 = vpop.f32.mrf.mxu3 }
 0x311   : > { %v1161_v54 = vadd.f32 %v1154_v45, %v2620_v53  ;;  %v1117_v60 = vpop.f32.mrf.mxu0  ;;  %v1130_v63 = vpop.f32.mrf.mxu1  ;;  %v1160_v30 = vadd.f32 %v1141_v52, %v2621_v21  ;;  %v1376_v52 = vlaneseq }
 0x313   : > { %v1759_v3 = vmul.f32 -1.442695, %v1161_v54  ;;  %v2541_v53 = vand.u32 127, %v1376_v52  ;;  %v1380_v54 = vpop.permute.xlu2 %1379 }
 0x314   : > { %v1956_v6 = vpop.eup %1955 }
 0x315   : > { %v1958_v57 = vpop.eup %1957  ;;  %v1165_v10 = vadd.f32 1.0, %v1956_v6  ;;  %1959 = vpow2.f32 %v1759_v3  ;;  %vm1390_vm1 = vcmp.eq.s32.totalorder %v2541_v53, %v1380_v54 }
 0x316   : > { %v1184_v2 = vadd.f32 1.0, %v1958_v57 }
 0x317   : > { %1961 = vrcp.f32 %v1165_v10  ;;  %v1175_v20 = vand.u32 2147483647, %v1165_v10  ;;  %v1177_v42 = vand.u32 2147483648, %v1165_v10  ;;  %vm1171_vm7 = vweird.f32 %v1165_v10 }
 0x318   : > { %1963 = vrcp.f32 %v1184_v2  ;;  %v1143_v14 = vpop.f32.mrf.mxu2  ;;  %v1156_v17 = vpop.f32.mrf.mxu3  ;;  %v1196_v34 = vand.u32 2147483648, %v1184_v2  ;;  %v1194_v62 = vand.u32 2147483647, %v1184_v2  ;;  %vm1190_vm8 = vweird.f32 %v1184_v2 }
 0x319   : > { %v1322_v22 = vpop.f32.mrf.mxu0  ;;  %v1178_v38 = vor.u32 1.1754944e-38, %v1177_v42  ;;  %vm1176_vm11 = vcmp.eq.f32.partialorder %v1175_v20, 8.507059e+37 }
 0x31a   : > { %v2526_v26 = vadd.f32 %v2523_v46, %v1322_v22  ;;  %v1197_v27 = vor.u32 1.1754944e-38, %v1196_v34  ;;  %vm1195_vm12 = vcmp.eq.f32.partialorder %v1194_v62, 8.507059e+37 }
 0x31b   : > { %v1960_v37 = vpop.eup %1959 }
 0x31c   : > { %v1204_v43 = vadd.f32 1.0, %v1960_v37  ;;  %1332 = vmax.xlane.f32.xlu0 %v2526_v26  ;;  %v1394_v60 = vsel %vm1390_vm1, %v2526_v26, 0.0 }
 0x31d   : > { %v1962_v4 = vpop.eup %1961 }
 0x31e   : > { %v1964_v15 = vpop.eup %1963  ;;  %v1167_v24 = vmul.f32 %v1962_v4, %v1165_v10  ;;  %1965 = vrcp.f32 %v1204_v43  ;;  %vm1172_vm5 = vweird.f32 %v1962_v4  ;;  %v1216_v7 = vand.u32 2147483648, %v1204_v43  ;;  %v1375_v10 = vld [vmem:[%s2189_s26 + $0x18] sm:$0xff] }
 0x31f   : > { %v1186_v51 = vmul.f32 %v1964_v15, %v1184_v2  ;;  %1967 = vtanh.f32 %v1160_v30  ;;  %vm1191_vm6 = vweird.f32 %v1964_v15  ;;  %vm1173_vm9 = vmor %vm1171_vm7, %vm1172_vm5  ;;  %vm1210_vm14 = vweird.f32 %v1204_v43 }
 0x320   : > { %v1168_v41 = vsub.f32 1.0, %v1167_v24  ;;  %vm1192_vm10 = vmor %vm1190_vm8, %vm1191_vm6  ;;  %v1214_v12 = vand.u32 2147483647, %v1204_v43  ;;  %v1217_v19 = vor.u32 1.1754944e-38, %v1216_v7  ;;  %v1383_v24 = vpop.permute.xlu2 %1382  ;;  %vm1431_vm6 = vcmask 64512  }
 0x321   : > { %v1187_v47 = vsub.f32 1.0, %v1186_v51  ;;  %v1324_v32 = vpop.f32.mrf.mxu0  ;;  %vm1391_vm2 = vcmp.eq.s32.totalorder %v2541_v53, %v1383_v24  ;;  %vm1439_vm7 = vcmask 57344  }
 0x322   : > { %v1169_v23 = vmul.f32 %v1962_v4, %v1168_v41  ;;  %v2531_v9 = vadd.f32 %v2523_v46, %v1324_v32  ;;  %vm1215_vm0 = vcmp.eq.f32.partialorder %v1214_v12, 8.507059e+37  ;;  %v1412_v12 = vld [vmem:[%s2194_s13 + $0x10] sm:$0xff] }
 0x323   : > { %v1188_v44 = vmul.f32 %v1964_v15, %v1187_v47 }
 0x324   : > { %v1966_v31 = vpop.eup %1965  ;;  %v1170_v50 = vadd.f32 %v1962_v4, %v1169_v23  ;;  %1334 = vmax.xlane.f32.xlu0 %v2531_v9  ;;  %v1395_v51 = vsel %vm1391_vm2, %v2531_v9, 0.0 }
 0x325   : > { %v1189_v56 = vadd.f32 %v1964_v15, %v1188_v44  ;;  %v1206_v61 = vmul.f32 %v1966_v31, %v1204_v43  ;;  %v1968_v8 = vpop.eup %1967  ;;  %vm1211_vm13 = vweird.f32 %v1966_v31 }
 0x326   : > { %v1174_v1 = vsel %vm1173_vm9, %v1962_v4, %v1170_v50  ;;  %vm1212_vm15 = vmor %vm1210_vm14, %vm1211_vm13 }
 0x327   : > { %v1179_v13 = vsel %vm1176_vm11, %v1178_v38, %v1174_v1  ;;  %v1193_v33 = vsel %vm1192_vm10, %v1964_v15, %v1189_v56  ;;  %v1207_v16 = vsub.f32 1.0, %v1206_v61 }
 0x328   : > { %v1198_v55 = vsel %vm1195_vm12, %v1197_v27, %v1193_v33  ;;  %v1221_v58 = vmul.f32 %v1968_v8, %v1179_v13 }
 0x329   : > { %v1220_v59 = vmul.f32 %v1198_v55, %v2512_v48  ;;  %v1208_v0 = vmul.f32 %v1966_v31, %v1207_v16  ;;  %v1411_v55 = vld [vmem:[%s2194_s13 + $0x8] sm:$0xff] }
 0x32b   : > { %v1222_v5 = vadd.f32 %v1221_v58, %v1220_v59  ;;  %v1209_v11 = vadd.f32 %v1966_v31, %v1208_v0  ;;  %v1410_v59 = vld [vmem:[%s2194_s13] sm:$0xff] }
 0x32d   : > { %1969 = vtanh.f32 %v1222_v5  ;;  %1228 = vst [vmem:[#allocation8] sm:$0xff] %v1222_v5  ;;  %v1213_v18 = vsel %vm1212_vm15, %v1966_v31, %v1209_v11 }
 0x32e   : > { %v1218_v28 = vsel %vm1215_vm0, %v1217_v19, %v1213_v18 }
 0x333   : > { %v1970_v25 = vpop.eup %1969 }
 0x334   : > { %v1224_v29 = vmul.f32 %v1970_v25, %v1218_v28 }
 0x336   : > { %v1225_v36 = vpack.c.bf16 %v1224_v29, %v1224_v29  ;;  %v1413_v29 = vld [vmem:[%s2194_s13 + $0x18] sm:$0xff] }
 0x338   : > { %1226 = vst [vmem:[#allocation6 + $0xc] sm:$0xf] %v1225_v36  ;;  %1385 = vperm.xlu0 %1904, %v1374_v35  }
 0x339   : > { %1227 = vst [vmem:[#allocation7] sm:$0xf] %v1225_v36 }
 0x33f   : > { %v1851_v48 = vld [vmem:[#allocation6 + $0x8] sm:$0xff] }
 0x340   : > { %1326 = vmatmul.bf16.gmra.mxu0 %v1851_v48 }
 0x38f   : > { %v2536_v39 = vpop.xlane.xlu0 %1332 }
 0x390   : > { %v1340_v40 = vsub.f32 %v2526_v26, %v2536_v39 }
 0x392   : > { %v1344_v49 = vmul.f32 1.442695, %v1340_v40 }
 0x394   : > { %1971 = vpow2.f32 %v1344_v49  ;;  %v1423_v49 = vshrl.u32 %v1376_v52, 7 }
 0x396   : > { %vm1424_vm5 = vcmp.eq.s32.totalorder %v1423_v49, %v2541_v53 }
 0x397   : > { %v1335_v2 = vpop.xlane.xlu0 %1334 }
 0x398   : > { %v1341_v14 = vsub.f32 %v2531_v9, %v1335_v2 }
 0x39a   : > { %v1972_v45 = vpop.eup %1971  ;;  %v1346_v17 = vmul.f32 1.442695, %v1341_v14 }
 0x39b   : > { %1352 = vadd.xlane.f32.xlu2 %v1972_v45 }
 0x39c   : > { %1973 = vpow2.f32 %v1346_v17 }
 0x3a2   : > { %v1974_v22 = vpop.eup %1973 }
 0x3a3   : > { %1398 = vadd.xlane.f32.xlu2 %v1394_v60 }
 0x3aa   : > { %v1386_v41 = vpop.permute.xlu0 %1385 }
 0x3ab   : > { %vm1392_vm3 = vcmp.eq.s32.totalorder %v2541_v53, %v1386_v41 }
 0x3bd   : > { %v1327_v63 = vpop.f32.mrf.mxu0 }
 0x3be   : > { %v1328_v3 = vadd.f32 %v2523_v46, %v1327_v63 }
 0x3c0   : > { %1336 = vmax.xlane.f32.xlu1 %v1328_v3  ;;  %v1396_v42 = vsel %vm1392_vm3, %v1328_v3, 0.0 }
 0x3c5   : > { %v1329_v6 = vpop.f32.mrf.mxu0 }
 0x3c6   : > { %v1330_v57 = vadd.f32 %v2523_v46, %v1329_v6 }
 0x3c8   : > { %1338 = vmax.xlane.f32.xlu1 %v1330_v57 }
 0x3e1   : > { %1388 = vperm.xlu1 %1905, %v1375_v10  }
 0x40b   : > { %1354 = vadd.xlane.f32.xlu1 %v1974_v22 }
 0x40e   : > { %v1353_v32 = vpop.xlane.xlu2 %1352 }
 0x416   : > { %v1399_v34 = vpop.xlane.xlu2 %1398 }
 0x433   : > { %v1337_v37 = vpop.xlane.xlu1 %1336 }
 0x434   : > { %v1342_v26 = vsub.f32 %v1328_v3, %v1337_v37 }
 0x436   : > { %v1348_v43 = vmul.f32 1.442695, %v1342_v26 }
 0x438   : > { %1975 = vpow2.f32 %v1348_v43 }
 0x43b   : > { %v1339_v4 = vpop.xlane.xlu1 %1338 }
 0x43c   : > { %v1343_v21 = vsub.f32 %v1330_v57, %v1339_v4 }
 0x43e   : > { %v1976_v30 = vpop.eup %1975  ;;  %v1350_v15 = vmul.f32 1.442695, %v1343_v21 }
 0x43f   : > { %1356 = vadd.xlane.f32.xlu0 %v1976_v30 }
 0x440   : > { %1977 = vpow2.f32 %v1350_v15 }
 0x441   : > { %1979 = vlog2.f32 %v1353_v32 }
 0x446   : > { %v1978_v46 = vpop.eup %1977 }
 0x447   : > { %1358 = vadd.xlane.f32.xlu2 %v1978_v46  ;;  %v1980_v9 = vpop.eup %1979 }
 0x448   : > { %v1361_v50 = vmul.f32 0.6931472, %v1980_v9 }
 0x44a   : > { %v1368_v1 = vadd.f32 %v1361_v50, %v2536_v39 }
 0x44c   : > { %v1406_v58 = vsub.f32 %v1368_v1, %v1399_v34 }
 0x44e   : > { %v1414_v19 = vmul.f32 %v1410_v59, %v1406_v58 }
 0x44f   : > { %1400 = vadd.xlane.f32.xlu2 %v1395_v51 }
 0x453   : > { %v1389_v47 = vpop.permute.xlu1 %1388 }
 0x454   : > { %vm1393_vm4 = vcmp.eq.s32.totalorder %v2541_v53, %v1389_v47 }
 0x455   : > { %v1397_v20 = vsel %vm1393_vm4, %v1330_v57, 0.0 }
 0x456   : > { %1404 = vadd.xlane.f32.xlu1 %v1397_v20 }
 0x457   : > { %1402 = vadd.xlane.f32.xlu2 %v1396_v42 }
 0x47e   : > { %v1355_v23 = vpop.xlane.xlu1 %1354 }
 0x47f   : > { %1981 = vlog2.f32 %v1355_v23 }
 0x485   : > { %v1982_v31 = vpop.eup %1981 }
 0x486   : > { %v1363_v38 = vmul.f32 0.6931472, %v1982_v31 }
 0x488   : > { %v1369_v8 = vadd.f32 %v1363_v38, %v1335_v2 }
 0x4b2   : > { %v1357_v44 = vpop.xlane.xlu0 %1356 }
 0x4b3   : > { %1983 = vlog2.f32 %v1357_v44 }
 0x4b9   : > { %v1984_v56 = vpop.eup %1983 }
 0x4ba   : > { %v1359_v62 = vpop.xlane.xlu2 %1358  ;;  %v1365_v13 = vmul.f32 0.6931472, %v1984_v56 }
 0x4bb   : > { %1985 = vlog2.f32 %v1359_v62 }
 0x4bc   : > { %v1370_v7 = vadd.f32 %v1365_v13, %v1337_v37 }
 0x4c1   : > { %v1986_v61 = vpop.eup %1985 }
 0x4c2   : > { %v1401_v27 = vpop.xlane.xlu2 %1400  ;;  %v1367_v33 = vmul.f32 0.6931472, %v1986_v61 }
 0x4c3   : > { %v1407_v16 = vsub.f32 %v1369_v8, %v1401_v27 }
 0x4c4   : > { %v1371_v11 = vadd.f32 %v1367_v33, %v1339_v4 }
 0x4c5   : > { %v1415_v0 = vmul.f32 %v1411_v55, %v1407_v16 }
 0x4c7   : > { %v1419_v35 = vadd.f32 %v1415_v0, %v1414_v19 }
 0x4c9   : > { %v1405_v5 = vpop.xlane.xlu1 %1404 }
 0x4ca   : > { %v1403_v18 = vpop.xlane.xlu2 %1402  ;;  %v1409_v25 = vsub.f32 %v1371_v11, %v1405_v5 }
 0x4cb   : > { %v1408_v28 = vsub.f32 %v1370_v7, %v1403_v18 }
 0x4cc   : > { %v1417_v48 = vmul.f32 %v1413_v29, %v1409_v25 }
 0x4cd   : > { %v1416_v36 = vmul.f32 %v1412_v12, %v1408_v28 }
 0x4cf   : > { %v1420_v39 = vadd.f32 %v1419_v35, %v1416_v36 }
 0x4d1   : > { %v1421_v40 = vadd.f32 %v1420_v39, %v1417_v48 }
 0x4d3   : > { %1427 = vperm.xlu2 %1903, %v1421_v40  }
 0x52d   : > { %v1428_v45 = vpop.permute.xlu2 %1427 }
 0x52e   : > { %v1430_v54 = vsel %vm1424_vm5, %v1428_v45, 0.0 }
 0x52f   : > { %v1432_v60 = vsel %vm1431_vm6, %v1430_v54, 0.0 }
 0x530   : > { %v1433_v63 = vrot.slane %v1432_v60, 4 }
 0x532   : > { %v1434_v3 = vadd.f32 %v1433_v63, %v1432_v60 }
 0x534   : > { %v1435_v6 = vrot.slane %v1434_v3, 2 }
 0x536   : > { %v1436_v57 = vadd.f32 %v1435_v6, %v1434_v3 }
 0x538   : > { %v1437_v52 = vrot.slane %v1436_v57, 1 }
 0x53a   : > { %v1438_v53 = vadd.f32 %v1437_v52, %v1436_v57 }
 0x53c   : > { %1440 = vst.msk [vmem:[%s2198_s14] sm:$0x1] %vm1439_vm7, %v1438_v53 }
 0x53d   : > { %2038 = shalt.err (!%p2035_p4)
}
 0x53e   : > { %1860 = dma.vmem_to_hbm [thread:$0]  (%p2168_p5), %s1453_s25, 16, %s1455_s17, %s1442_s12  }
 0x53f PF: > { %p1866_p7 = scmp.ge.s32.totalorder %s2079_s30, 2  ;;  %s1466_s14 = sand.u32 1, %s2067_s27  }
 0x540   : > { %s1467_s10 = scalar_lea.sflag [#allocation11], %s1466_s14 }
 0x541   : > { %p1863_p8 = pnand %p1866_p7, %p2172_p6 }
 0x543   : > { %p1864_p9 = pneg %p1863_p8 }
 0x545   : > { %2062 = dma.done.wait (%p1864_p9), %s1467_s10, 16  }
 0x546   : > { %2064 = vsyncadd (%p1864_p9), %s1467_s10, 4294967280  ;;  %s2623_s19 = sld [smem:[#allocation22_spill]]  ;;  %p18_p10 = scmp.ge.s32.totalorder %s2155_s11, 5  }
 0x547   : > { %s2624_s27 = smov %s2071_s28  ;;  %s2625_s28 = smov %s2075_s29 }
 0x548   : > { %s2627_s30 = smov %s2155_s11  ;;  %20 = sbr.rel (!%p18_p10) target bundleno = 7 (0x7), region = 139 }
 0x54c   : > { %s2626_s29 = smov %s2623_s19 }
 0x54d   :  { %1472 = vsyncpa [#allocation11], 1 }
 0x54e   :  { %1474 = vsyncpa [#allocation11 + $0x1], 1 }
 0x54f   :  { %1475 = vsyncmov [#allocation9] }
 0x552   :  { %s1476_s30 = vpop.sfrf %1475 }
 0x553   :  { %p1802_p5 = scmp.ne.s32.totalorder %s1476_s30, 0 }
 0x555   :  { %1480 = shalt.err (%p1802_p5)  }
 0x556   :  { %1482 = vsyncmov [#allocation9 + $0x1] }
 0x559   :  { %s1483_s15 = vpop.sfrf %1482 }
 0x55a   :  { %p1803_p6 = scmp.ne.s32.totalorder %s1483_s15, 0 }
 0x55c   :  { %1487 = shalt.err (%p1803_p6)  }
 0x55d   :  { %1489 = vsyncmov [#allocation9 + $0x2] }
 0x560   :  { %s1490_s16 = vpop.sfrf %1489 }
 0x561   :  { %p1804_p11 = scmp.ne.s32.totalorder %s1490_s16, 0 }
 0x563   :  { %1494 = shalt.err (%p1804_p11)  }

</bundles_post_ra>
